<compile_context>
chip_gen: v5e
topology: v5e:2x2
jax: 0.10.0
libtpu: 0.0.40
codegen_flags: <defaults>
</compile_context>

<pallas_src>
import functools

import jax
import jax.numpy as jnp
from jax.experimental import pallas as pl
from jax.experimental.pallas import tpu as pltpu

KSIZE = 7
PAD = 3


def cbam_kernel(x_ref, w1_ref, w2_ref, wsa_ref, vmask_ref, hmask_ref, out_ref,
                *, H, W):
    HW = H * W
    x = x_ref[0]                                      # (C, HW) f32, C on sublanes

    # ---------------- Channel attention ----------------
    avg_c = jnp.mean(x, axis=1, keepdims=True)        # (C, 1) == AdaptiveAvgPool2d(1)
    max_c = jnp.max(x, axis=1, keepdims=True)         # (C, 1) == AdaptiveMaxPool2d(1)
    pooled = jnp.concatenate([avg_c, max_c], axis=1)  # (C, 2)  fused MLP input

    h = jnp.dot(w1_ref[...], pooled, preferred_element_type=jnp.float32)   # (Cr, 2)
    h = jnp.maximum(h, 0.0)
    z = jnp.dot(w2_ref[...], h, preferred_element_type=jnp.float32)        # (C, 2)
    ca = jax.nn.sigmoid(jnp.sum(z, axis=1, keepdims=True))                 # (C, 1)

    x1 = x * ca                                       # channel-scaled features (C, HW)

    # ---------------- Spatial attention ----------------
    s_avg = jnp.mean(x1, axis=0, keepdims=True)       # (1, HW) mean over channels
    s_max = jnp.max(x1, axis=0, keepdims=True)        # (1, HW) max over channels
    s = jnp.concatenate([s_avg, s_max], axis=0)       # (2, HW)  rows = [avg, max]

    # Precomputed zero-padding border masks (grid-invariant, VMEM-resident).
    vm_all = vmask_ref[...]                           # (7, HW): row-validity per ki
    hm_all = hmask_ref[...]                           # (7, HW): col-validity per kj
    wv = wsa_ref[...]                                 # (2, 49) conv weights

    # 7x7 "same" cross-correlation (matches PyTorch Conv2d), 2 in-ch -> 1 out-ch.
    # Each tap is a static lane rotation of the flattened planes (XLU), masked at
    # the image borders, then a per-channel weight FMA (VALU).
    acc = jnp.zeros((2, HW), jnp.float32)
    for ki in range(KSIZE):
        vm = vm_all[ki:ki + 1, :]                     # (1, HW)
        for kj in range(KSIZE):
            off = (ki - PAD) * W + (kj - PAD)
            if off == 0:
                rolled = s
            else:
                rolled = pltpu.roll(s, (-off) % HW, 1)  # rolled[:, n] == s[:, (n+off) % HW]
            m = vm * hm_all[kj:kj + 1, :]             # (1, HW) zero-padding mask
            t = ki * KSIZE + kj
            acc = acc + (rolled * m) * wv[:, t:t + 1]
    conv = jnp.sum(acc, axis=0, keepdims=True)        # (1, HW)
    sa = jax.nn.sigmoid(conv)

    out_ref[0] = (x1 * sa).astype(out_ref.dtype)      # spatially-scaled output (C, HW)


def cbam_pallas(x_nchw, fc1_w, fc2_w, sa_w):
    """x_nchw: (N, C, H, W) f32; fc1_w: (Cr, C, 1, 1); fc2_w: (C, Cr, 1, 1);
    sa_w: (1, 2, 7, 7). Returns (N, C, H, W) f32."""
    N, C, H, W = x_nchw.shape
    Cr = fc1_w.shape[0]
    HW = H * W

    x_flat = x_nchw.reshape(N, C, HW).astype(jnp.float32)   # metadata-only reshape
    w1 = fc1_w[:, :, 0, 0].astype(jnp.float32)              # (Cr, C)
    w2 = fc2_w[:, :, 0, 0].astype(jnp.float32)              # (C, Cr)
    wsa = sa_w.reshape(2, KSIZE * KSIZE).astype(jnp.float32)

    # Grid-invariant zero-padding border masks, computed once outside the kernel.
    pos = jnp.arange(HW, dtype=jnp.int32)
    row = pos // W
    col = pos - row * W
    vmask = jnp.stack(
        [((row + (k - PAD) >= 0) & (row + (k - PAD) < H)) for k in range(KSIZE)]
    ).astype(jnp.float32)                                    # (7, HW)
    hmask = jnp.stack(
        [((col + (k - PAD) >= 0) & (col + (k - PAD) < W)) for k in range(KSIZE)]
    ).astype(jnp.float32)                                    # (7, HW)

    kernel = functools.partial(cbam_kernel, H=H, W=W)

    out_flat = pl.pallas_call(
        kernel,
        out_shape=jax.ShapeDtypeStruct((N, C, HW), jnp.float32),
        grid=(N,),
        in_specs=[
            pl.BlockSpec((1, C, HW), lambda n: (n, 0, 0)),
            pl.BlockSpec((Cr, C), lambda n: (0, 0)),
            pl.BlockSpec((C, Cr), lambda n: (0, 0)),
            pl.BlockSpec((2, KSIZE * KSIZE), lambda n: (0, 0)),
            pl.BlockSpec((KSIZE, HW), lambda n: (0, 0)),
            pl.BlockSpec((KSIZE, HW), lambda n: (0, 0)),
        ],
        out_specs=pl.BlockSpec((1, C, HW), lambda n: (n, 0, 0)),
        compiler_params=pltpu.CompilerParams(
            dimension_semantics=("parallel",)),      # let v7x shard batch over 2 TCs
    )(x_flat, w1, w2, wsa, vmask, hmask)

    return out_flat.reshape(N, C, H, W)


def cbam_reference(x, fc1_w, fc2_w, sa_w):
    """Plain-JAX NCHW reference mirroring the PyTorch module exactly."""
    w1 = fc1_w[:, :, 0, 0]   # (Cr, C)
    w2 = fc2_w[:, :, 0, 0]   # (C, Cr)

    avg_p = jnp.mean(x, axis=(2, 3), keepdims=True)   # (N, C, 1, 1)
    max_p = jnp.max(x, axis=(2, 3), keepdims=True)

    def mlp(p):
        h = jnp.maximum(jnp.einsum('oc,nchw->nohw', w1, p), 0.0)
        return jnp.einsum('oc,nchw->nohw', w2, h)

    ca = jax.nn.sigmoid(mlp(avg_p) + mlp(max_p))       # (N, C, 1, 1)
    x1 = ca * x

    avg_s = jnp.mean(x1, axis=1, keepdims=True)
    max_s = jnp.max(x1, axis=1, keepdims=True)
    cat = jnp.concatenate([avg_s, max_s], axis=1)      # (N, 2, H, W)
    conv = jax.lax.conv_general_dilated(
        cat, sa_w, window_strides=(1, 1), padding=((PAD, PAD), (PAD, PAD)),
        dimension_numbers=('NCHW', 'OIHW', 'NCHW'))
    sa = jax.nn.sigmoid(conv)                          # (N, 1, H, W)
    return sa * x1


if __name__ == "__main__":
    N, C, H, W = 2, 4, 16, 16
    ratio = 2
    Cr = C // ratio

    key = jax.random.PRNGKey(0)
    kx, k1, k2, k3 = jax.random.split(key, 4)

    x = jax.random.normal(kx, (N, C, H, W), dtype=jnp.float32)
    fc1_w = 0.3 * jax.random.normal(k1, (Cr, C, 1, 1), dtype=jnp.float32)
    fc2_w = 0.3 * jax.random.normal(k2, (C, Cr, 1, 1), dtype=jnp.float32)
    sa_w = 0.1 * jax.random.normal(k3, (1, 2, KSIZE, KSIZE), dtype=jnp.float32)

    out = jax.block_until_ready(cbam_pallas(x, fc1_w, fc2_w, sa_w))
    ref = jax.block_until_ready(cbam_reference(x, fc1_w, fc2_w, sa_w))

    assert out.shape == (N, C, H, W)
    assert jnp.allclose(out, ref, atol=1e-4, rtol=1e-4), (
        f"max abs err = {jnp.max(jnp.abs(out - ref))}")
    print("KERNEL_OK")
</pallas_src>

<mosaic_0001>
module attributes {stable_mosaic.version = 11 : i64} {
  func.func @cbam_kernel(%arg0: i32, %arg1: memref<1x4x256xf32, #tpu.memory_space<vmem>>, %arg2: memref<2x4xf32, #tpu.memory_space<vmem>>, %arg3: memref<4x2xf32, #tpu.memory_space<vmem>>, %arg4: memref<2x49xf32, #tpu.memory_space<vmem>>, %arg5: memref<7x256xf32, #tpu.memory_space<vmem>>, %arg6: memref<7x256xf32, #tpu.memory_space<vmem>>, %arg7: memref<1x4x256xf32, #tpu.memory_space<vmem>>) attributes {dimension_semantics = [#tpu.dimension_semantics<parallel>], iteration_bounds = array<i64: 2>, scalar_prefetch = 0 : i64, scratch_operands = 0 : i64, tpu.core_type = #tpu.core_type<tc>, window_params = [{transform_indices = @transform_0, window_bounds = array<i64: 1, 4, 256>}, {pipeline_mode = #tpu.pipeline_mode<synchronous>, transform_indices = @transform_1, window_bounds = array<i64: 2, 4>}, {pipeline_mode = #tpu.pipeline_mode<synchronous>, transform_indices = @transform_2, window_bounds = array<i64: 4, 2>}, {pipeline_mode = #tpu.pipeline_mode<synchronous>, transform_indices = @transform_3, window_bounds = array<i64: 2, 49>}, {pipeline_mode = #tpu.pipeline_mode<synchronous>, transform_indices = @transform_4, window_bounds = array<i64: 7, 256>}, {pipeline_mode = #tpu.pipeline_mode<synchronous>, transform_indices = @transform_5, window_bounds = array<i64: 7, 256>}, {transform_indices = @transform_6, window_bounds = array<i64: 1, 4, 256>}]} {
    %c0 = arith.constant 0 : index
    %c0_0 = arith.constant 0 : index
    %c0_1 = arith.constant 0 : index
    %0 = vector.load %arg1[%c0, %c0_0, %c0_1] : memref<1x4x256xf32, #tpu.memory_space<vmem>>, vector<1x4x256xf32>
    %1 = vector.shape_cast %0 : vector<1x4x256xf32> to vector<4x256xf32>
    %cst = arith.constant dense<0.000000e+00> : vector<4xf32>
    %2 = vector.multi_reduction <add>, %1, %cst [1] : vector<4x256xf32> to vector<4xf32>
    %3 = vector.shape_cast %2 : vector<4xf32> to vector<4x1xf32>
    %cst_2 = arith.constant 2.560000e+02 : f32
    %4 = vector.broadcast %cst_2 : f32 to vector<4x1xf32>
    %5 = arith.divf %3, %4 : vector<4x1xf32>
    %cst_3 = arith.constant dense<0xFF800000> : vector<4xf32>
    %6 = vector.multi_reduction <maximumf>, %1, %cst_3 [1] : vector<4x256xf32> to vector<4xf32>
    %7 = vector.shape_cast %6 : vector<4xf32> to vector<4x1xf32>
    %8 = tpu.concatenate %5, %7 in 1 : vector<4x1xf32>, vector<4x1xf32> -> vector<4x2xf32>
    %c0_4 = arith.constant 0 : index
    %c0_5 = arith.constant 0 : index
    %9 = vector.load %arg2[%c0_4, %c0_5] : memref<2x4xf32, #tpu.memory_space<vmem>>, vector<2x4xf32>
    %cst_6 = arith.constant dense<0.000000e+00> : vector<2x2xf32>
    %10 = tpu.matmul %9, %8, %cst_6 {dimension_numbers = #tpu.dot_dimension_numbers<[1], [0], [0], [1], [0, 0, 1, 1], [], []>} : vector<2x4xf32>, vector<4x2xf32>, vector<2x2xf32> -> vector<2x2xf32>
    %cst_7 = arith.constant 0.000000e+00 : f32
    %11 = vector.broadcast %cst_7 : f32 to vector<2x2xf32>
    %12 = arith.maximumf %10, %11 : vector<2x2xf32>
    %c0_8 = arith.constant 0 : index
    %c0_9 = arith.constant 0 : index
    %13 = vector.load %arg3[%c0_8, %c0_9] : memref<4x2xf32, #tpu.memory_space<vmem>>, vector<4x2xf32>
    %cst_10 = arith.constant dense<0.000000e+00> : vector<4x2xf32>
    %14 = tpu.matmul %13, %12, %cst_10 {dimension_numbers = #tpu.dot_dimension_numbers<[1], [0], [0], [1], [0, 0, 1, 1], [], []>} : vector<4x2xf32>, vector<2x2xf32>, vector<4x2xf32> -> vector<4x2xf32>
    %cst_11 = arith.constant dense<0.000000e+00> : vector<4xf32>
    %15 = vector.multi_reduction <add>, %14, %cst_11 [1] : vector<4x2xf32> to vector<4xf32>
    %16 = vector.shape_cast %15 : vector<4xf32> to vector<4x1xf32>
    %17 = arith.negf %16 : vector<4x1xf32>
    %18 = math.exp %17 : vector<4x1xf32>
    %cst_12 = arith.constant 1.000000e+00 : f32
    %19 = vector.broadcast %cst_12 : f32 to vector<4x1xf32>
    %20 = arith.addf %19, %18 : vector<4x1xf32>
    %21 = arith.divf %19, %20 : vector<4x1xf32>
    %22 = vector.broadcast %21 : vector<4x1xf32> to vector<4x256xf32>
    %23 = arith.mulf %1, %22 : vector<4x256xf32>
    %cst_13 = arith.constant dense<0.000000e+00> : vector<256xf32>
    %24 = vector.multi_reduction <add>, %23, %cst_13 [0] : vector<4x256xf32> to vector<256xf32>
    %25 = vector.shape_cast %24 : vector<256xf32> to vector<1x256xf32>
    %cst_14 = arith.constant 4.000000e+00 : f32
    %26 = vector.broadcast %cst_14 : f32 to vector<1x256xf32>
    %27 = arith.divf %25, %26 : vector<1x256xf32>
    %cst_15 = arith.constant dense<0xFF800000> : vector<256xf32>
    %28 = vector.multi_reduction <maximumf>, %23, %cst_15 [0] : vector<4x256xf32> to vector<256xf32>
    %29 = vector.shape_cast %28 : vector<256xf32> to vector<1x256xf32>
    %30 = tpu.concatenate %27, %29 in 0 : vector<1x256xf32>, vector<1x256xf32> -> vector<2x256xf32>
    %c0_16 = arith.constant 0 : index
    %c0_17 = arith.constant 0 : index
    %31 = vector.load %arg5[%c0_16, %c0_17] : memref<7x256xf32, #tpu.memory_space<vmem>>, vector<7x256xf32>
    %c0_18 = arith.constant 0 : index
    %c0_19 = arith.constant 0 : index
    %32 = vector.load %arg6[%c0_18, %c0_19] : memref<7x256xf32, #tpu.memory_space<vmem>>, vector<7x256xf32>
    %c0_20 = arith.constant 0 : index
    %c0_21 = arith.constant 0 : index
    %33 = vector.load %arg4[%c0_20, %c0_21] : memref<2x49xf32, #tpu.memory_space<vmem>>, vector<2x49xf32>
    %cst_22 = arith.constant 0.000000e+00 : f32
    %34 = vector.broadcast %cst_22 : f32 to vector<2x256xf32>
    %35 = vector.extract_strided_slice %31 {offsets = [0, 0], sizes = [1, 256], strides = [1, 1]} : vector<7x256xf32> to vector<1x256xf32>
    %c51_i32 = arith.constant 51 : i32
    %36 = tpu.dynamic_rotate %30 by %c51_i32 dim 1 : vector<2x256xf32>, i32 -> vector<2x256xf32>
    %37 = vector.extract_strided_slice %32 {offsets = [0, 0], sizes = [1, 256], strides = [1, 1]} : vector<7x256xf32> to vector<1x256xf32>
    %38 = arith.mulf %35, %37 : vector<1x256xf32>
    %39 = vector.broadcast %38 : vector<1x256xf32> to vector<2x256xf32>
    %40 = arith.mulf %36, %39 : vector<2x256xf32>
    %41 = vector.extract_strided_slice %33 {offsets = [0, 0], sizes = [2, 1], strides = [1, 1]} : vector<2x49xf32> to vector<2x1xf32>
    %42 = vector.broadcast %41 : vector<2x1xf32> to vector<2x256xf32>
    %43 = arith.mulf %40, %42 : vector<2x256xf32>
    %44 = arith.addf %34, %43 : vector<2x256xf32>
    %c50_i32 = arith.constant 50 : i32
    %45 = tpu.dynamic_rotate %30 by %c50_i32 dim 1 : vector<2x256xf32>, i32 -> vector<2x256xf32>
    %46 = vector.extract_strided_slice %32 {offsets = [1, 0], sizes = [1, 256], strides = [1, 1]} : vector<7x256xf32> to vector<1x256xf32>
    %47 = arith.mulf %35, %46 : vector<1x256xf32>
    %48 = vector.broadcast %47 : vector<1x256xf32> to vector<2x256xf32>
    %49 = arith.mulf %45, %48 : vector<2x256xf32>
    %50 = vector.extract_strided_slice %33 {offsets = [0, 1], sizes = [2, 1], strides = [1, 1]} : vector<2x49xf32> to vector<2x1xf32>
    %51 = vector.broadcast %50 : vector<2x1xf32> to vector<2x256xf32>
    %52 = arith.mulf %49, %51 : vector<2x256xf32>
    %53 = arith.addf %44, %52 : vector<2x256xf32>
    %c49_i32 = arith.constant 49 : i32
    %54 = tpu.dynamic_rotate %30 by %c49_i32 dim 1 : vector<2x256xf32>, i32 -> vector<2x256xf32>
    %55 = vector.extract_strided_slice %32 {offsets = [2, 0], sizes = [1, 256], strides = [1, 1]} : vector<7x256xf32> to vector<1x256xf32>
    %56 = arith.mulf %35, %55 : vector<1x256xf32>
    %57 = vector.broadcast %56 : vector<1x256xf32> to vector<2x256xf32>
    %58 = arith.mulf %54, %57 : vector<2x256xf32>
    %59 = vector.extract_strided_slice %33 {offsets = [0, 2], sizes = [2, 1], strides = [1, 1]} : vector<2x49xf32> to vector<2x1xf32>
    %60 = vector.broadcast %59 : vector<2x1xf32> to vector<2x256xf32>
    %61 = arith.mulf %58, %60 : vector<2x256xf32>
    %62 = arith.addf %53, %61 : vector<2x256xf32>
    %c48_i32 = arith.constant 48 : i32
    %63 = tpu.dynamic_rotate %30 by %c48_i32 dim 1 : vector<2x256xf32>, i32 -> vector<2x256xf32>
    %64 = vector.extract_strided_slice %32 {offsets = [3, 0], sizes = [1, 256], strides = [1, 1]} : vector<7x256xf32> to vector<1x256xf32>
    %65 = arith.mulf %35, %64 : vector<1x256xf32>
    %66 = vector.broadcast %65 : vector<1x256xf32> to vector<2x256xf32>
    %67 = arith.mulf %63, %66 : vector<2x256xf32>
    %68 = vector.extract_strided_slice %33 {offsets = [0, 3], sizes = [2, 1], strides = [1, 1]} : vector<2x49xf32> to vector<2x1xf32>
    %69 = vector.broadcast %68 : vector<2x1xf32> to vector<2x256xf32>
    %70 = arith.mulf %67, %69 : vector<2x256xf32>
    %71 = arith.addf %62, %70 : vector<2x256xf32>
    %c47_i32 = arith.constant 47 : i32
    %72 = tpu.dynamic_rotate %30 by %c47_i32 dim 1 : vector<2x256xf32>, i32 -> vector<2x256xf32>
    %73 = vector.extract_strided_slice %32 {offsets = [4, 0], sizes = [1, 256], strides = [1, 1]} : vector<7x256xf32> to vector<1x256xf32>
    %74 = arith.mulf %35, %73 : vector<1x256xf32>
    %75 = vector.broadcast %74 : vector<1x256xf32> to vector<2x256xf32>
    %76 = arith.mulf %72, %75 : vector<2x256xf32>
    %77 = vector.extract_strided_slice %33 {offsets = [0, 4], sizes = [2, 1], strides = [1, 1]} : vector<2x49xf32> to vector<2x1xf32>
    %78 = vector.broadcast %77 : vector<2x1xf32> to vector<2x256xf32>
    %79 = arith.mulf %76, %78 : vector<2x256xf32>
    %80 = arith.addf %71, %79 : vector<2x256xf32>
    %c46_i32 = arith.constant 46 : i32
    %81 = tpu.dynamic_rotate %30 by %c46_i32 dim 1 : vector<2x256xf32>, i32 -> vector<2x256xf32>
    %82 = vector.extract_strided_slice %32 {offsets = [5, 0], sizes = [1, 256], strides = [1, 1]} : vector<7x256xf32> to vector<1x256xf32>
    %83 = arith.mulf %35, %82 : vector<1x256xf32>
    %84 = vector.broadcast %83 : vector<1x256xf32> to vector<2x256xf32>
    %85 = arith.mulf %81, %84 : vector<2x256xf32>
    %86 = vector.extract_strided_slice %33 {offsets = [0, 5], sizes = [2, 1], strides = [1, 1]} : vector<2x49xf32> to vector<2x1xf32>
    %87 = vector.broadcast %86 : vector<2x1xf32> to vector<2x256xf32>
    %88 = arith.mulf %85, %87 : vector<2x256xf32>
    %89 = arith.addf %80, %88 : vector<2x256xf32>
    %c45_i32 = arith.constant 45 : i32
    %90 = tpu.dynamic_rotate %30 by %c45_i32 dim 1 : vector<2x256xf32>, i32 -> vector<2x256xf32>
    %91 = vector.extract_strided_slice %32 {offsets = [6, 0], sizes = [1, 256], strides = [1, 1]} : vector<7x256xf32> to vector<1x256xf32>
    %92 = arith.mulf %35, %91 : vector<1x256xf32>
    %93 = vector.broadcast %92 : vector<1x256xf32> to vector<2x256xf32>
    %94 = arith.mulf %90, %93 : vector<2x256xf32>
    %95 = vector.extract_strided_slice %33 {offsets = [0, 6], sizes = [2, 1], strides = [1, 1]} : vector<2x49xf32> to vector<2x1xf32>
    %96 = vector.broadcast %95 : vector<2x1xf32> to vector<2x256xf32>
    %97 = arith.mulf %94, %96 : vector<2x256xf32>
    %98 = arith.addf %89, %97 : vector<2x256xf32>
    %99 = vector.extract_strided_slice %31 {offsets = [1, 0], sizes = [1, 256], strides = [1, 1]} : vector<7x256xf32> to vector<1x256xf32>
    %c35_i32 = arith.constant 35 : i32
    %100 = tpu.dynamic_rotate %30 by %c35_i32 dim 1 : vector<2x256xf32>, i32 -> vector<2x256xf32>
    %101 = vector.extract_strided_slice %32 {offsets = [0, 0], sizes = [1, 256], strides = [1, 1]} : vector<7x256xf32> to vector<1x256xf32>
    %102 = arith.mulf %99, %101 : vector<1x256xf32>
    %103 = vector.broadcast %102 : vector<1x256xf32> to vector<2x256xf32>
    %104 = arith.mulf %100, %103 : vector<2x256xf32>
    %105 = vector.extract_strided_slice %33 {offsets = [0, 7], sizes = [2, 1], strides = [1, 1]} : vector<2x49xf32> to vector<2x1xf32>
    %106 = vector.broadcast %105 : vector<2x1xf32> to vector<2x256xf32>
    %107 = arith.mulf %104, %106 : vector<2x256xf32>
    %108 = arith.addf %98, %107 : vector<2x256xf32>
    %c34_i32 = arith.constant 34 : i32
    %109 = tpu.dynamic_rotate %30 by %c34_i32 dim 1 : vector<2x256xf32>, i32 -> vector<2x256xf32>
    %110 = vector.extract_strided_slice %32 {offsets = [1, 0], sizes = [1, 256], strides = [1, 1]} : vector<7x256xf32> to vector<1x256xf32>
    %111 = arith.mulf %99, %110 : vector<1x256xf32>
    %112 = vector.broadcast %111 : vector<1x256xf32> to vector<2x256xf32>
    %113 = arith.mulf %109, %112 : vector<2x256xf32>
    %114 = vector.extract_strided_slice %33 {offsets = [0, 8], sizes = [2, 1], strides = [1, 1]} : vector<2x49xf32> to vector<2x1xf32>
    %115 = vector.broadcast %114 : vector<2x1xf32> to vector<2x256xf32>
    %116 = arith.mulf %113, %115 : vector<2x256xf32>
    %117 = arith.addf %108, %116 : vector<2x256xf32>
    %c33_i32 = arith.constant 33 : i32
    %118 = tpu.dynamic_rotate %30 by %c33_i32 dim 1 : vector<2x256xf32>, i32 -> vector<2x256xf32>
    %119 = vector.extract_strided_slice %32 {offsets = [2, 0], sizes = [1, 256], strides = [1, 1]} : vector<7x256xf32> to vector<1x256xf32>
    %120 = arith.mulf %99, %119 : vector<1x256xf32>
    %121 = vector.broadcast %120 : vector<1x256xf32> to vector<2x256xf32>
    %122 = arith.mulf %118, %121 : vector<2x256xf32>
    %123 = vector.extract_strided_slice %33 {offsets = [0, 9], sizes = [2, 1], strides = [1, 1]} : vector<2x49xf32> to vector<2x1xf32>
    %124 = vector.broadcast %123 : vector<2x1xf32> to vector<2x256xf32>
    %125 = arith.mulf %122, %124 : vector<2x256xf32>
    %126 = arith.addf %117, %125 : vector<2x256xf32>
    %c32_i32 = arith.constant 32 : i32
    %127 = tpu.dynamic_rotate %30 by %c32_i32 dim 1 : vector<2x256xf32>, i32 -> vector<2x256xf32>
    %128 = vector.extract_strided_slice %32 {offsets = [3, 0], sizes = [1, 256], strides = [1, 1]} : vector<7x256xf32> to vector<1x256xf32>
    %129 = arith.mulf %99, %128 : vector<1x256xf32>
    %130 = vector.broadcast %129 : vector<1x256xf32> to vector<2x256xf32>
    %131 = arith.mulf %127, %130 : vector<2x256xf32>
    %132 = vector.extract_strided_slice %33 {offsets = [0, 10], sizes = [2, 1], strides = [1, 1]} : vector<2x49xf32> to vector<2x1xf32>
    %133 = vector.broadcast %132 : vector<2x1xf32> to vector<2x256xf32>
    %134 = arith.mulf %131, %133 : vector<2x256xf32>
    %135 = arith.addf %126, %134 : vector<2x256xf32>
    %c31_i32 = arith.constant 31 : i32
    %136 = tpu.dynamic_rotate %30 by %c31_i32 dim 1 : vector<2x256xf32>, i32 -> vector<2x256xf32>
    %137 = vector.extract_strided_slice %32 {offsets = [4, 0], sizes = [1, 256], strides = [1, 1]} : vector<7x256xf32> to vector<1x256xf32>
    %138 = arith.mulf %99, %137 : vector<1x256xf32>
    %139 = vector.broadcast %138 : vector<1x256xf32> to vector<2x256xf32>
    %140 = arith.mulf %136, %139 : vector<2x256xf32>
    %141 = vector.extract_strided_slice %33 {offsets = [0, 11], sizes = [2, 1], strides = [1, 1]} : vector<2x49xf32> to vector<2x1xf32>
    %142 = vector.broadcast %141 : vector<2x1xf32> to vector<2x256xf32>
    %143 = arith.mulf %140, %142 : vector<2x256xf32>
    %144 = arith.addf %135, %143 : vector<2x256xf32>
    %c30_i32 = arith.constant 30 : i32
    %145 = tpu.dynamic_rotate %30 by %c30_i32 dim 1 : vector<2x256xf32>, i32 -> vector<2x256xf32>
    %146 = vector.extract_strided_slice %32 {offsets = [5, 0], sizes = [1, 256], strides = [1, 1]} : vector<7x256xf32> to vector<1x256xf32>
    %147 = arith.mulf %99, %146 : vector<1x256xf32>
    %148 = vector.broadcast %147 : vector<1x256xf32> to vector<2x256xf32>
    %149 = arith.mulf %145, %148 : vector<2x256xf32>
    %150 = vector.extract_strided_slice %33 {offsets = [0, 12], sizes = [2, 1], strides = [1, 1]} : vector<2x49xf32> to vector<2x1xf32>
    %151 = vector.broadcast %150 : vector<2x1xf32> to vector<2x256xf32>
    %152 = arith.mulf %149, %151 : vector<2x256xf32>
    %153 = arith.addf %144, %152 : vector<2x256xf32>
    %c29_i32 = arith.constant 29 : i32
    %154 = tpu.dynamic_rotate %30 by %c29_i32 dim 1 : vector<2x256xf32>, i32 -> vector<2x256xf32>
    %155 = vector.extract_strided_slice %32 {offsets = [6, 0], sizes = [1, 256], strides = [1, 1]} : vector<7x256xf32> to vector<1x256xf32>
    %156 = arith.mulf %99, %155 : vector<1x256xf32>
    %157 = vector.broadcast %156 : vector<1x256xf32> to vector<2x256xf32>
    %158 = arith.mulf %154, %157 : vector<2x256xf32>
    %159 = vector.extract_strided_slice %33 {offsets = [0, 13], sizes = [2, 1], strides = [1, 1]} : vector<2x49xf32> to vector<2x1xf32>
    %160 = vector.broadcast %159 : vector<2x1xf32> to vector<2x256xf32>
    %161 = arith.mulf %158, %160 : vector<2x256xf32>
    %162 = arith.addf %153, %161 : vector<2x256xf32>
    %163 = vector.extract_strided_slice %31 {offsets = [2, 0], sizes = [1, 256], strides = [1, 1]} : vector<7x256xf32> to vector<1x256xf32>
    %c19_i32 = arith.constant 19 : i32
    %164 = tpu.dynamic_rotate %30 by %c19_i32 dim 1 : vector<2x256xf32>, i32 -> vector<2x256xf32>
    %165 = vector.extract_strided_slice %32 {offsets = [0, 0], sizes = [1, 256], strides = [1, 1]} : vector<7x256xf32> to vector<1x256xf32>
    %166 = arith.mulf %163, %165 : vector<1x256xf32>
    %167 = vector.broadcast %166 : vector<1x256xf32> to vector<2x256xf32>
    %168 = arith.mulf %164, %167 : vector<2x256xf32>
    %169 = vector.extract_strided_slice %33 {offsets = [0, 14], sizes = [2, 1], strides = [1, 1]} : vector<2x49xf32> to vector<2x1xf32>
    %170 = vector.broadcast %169 : vector<2x1xf32> to vector<2x256xf32>
    %171 = arith.mulf %168, %170 : vector<2x256xf32>
    %172 = arith.addf %162, %171 : vector<2x256xf32>
    %c18_i32 = arith.constant 18 : i32
    %173 = tpu.dynamic_rotate %30 by %c18_i32 dim 1 : vector<2x256xf32>, i32 -> vector<2x256xf32>
    %174 = vector.extract_strided_slice %32 {offsets = [1, 0], sizes = [1, 256], strides = [1, 1]} : vector<7x256xf32> to vector<1x256xf32>
    %175 = arith.mulf %163, %174 : vector<1x256xf32>
    %176 = vector.broadcast %175 : vector<1x256xf32> to vector<2x256xf32>
    %177 = arith.mulf %173, %176 : vector<2x256xf32>
    %178 = vector.extract_strided_slice %33 {offsets = [0, 15], sizes = [2, 1], strides = [1, 1]} : vector<2x49xf32> to vector<2x1xf32>
    %179 = vector.broadcast %178 : vector<2x1xf32> to vector<2x256xf32>
    %180 = arith.mulf %177, %179 : vector<2x256xf32>
    %181 = arith.addf %172, %180 : vector<2x256xf32>
    %c17_i32 = arith.constant 17 : i32
    %182 = tpu.dynamic_rotate %30 by %c17_i32 dim 1 : vector<2x256xf32>, i32 -> vector<2x256xf32>
    %183 = vector.extract_strided_slice %32 {offsets = [2, 0], sizes = [1, 256], strides = [1, 1]} : vector<7x256xf32> to vector<1x256xf32>
    %184 = arith.mulf %163, %183 : vector<1x256xf32>
    %185 = vector.broadcast %184 : vector<1x256xf32> to vector<2x256xf32>
    %186 = arith.mulf %182, %185 : vector<2x256xf32>
    %187 = vector.extract_strided_slice %33 {offsets = [0, 16], sizes = [2, 1], strides = [1, 1]} : vector<2x49xf32> to vector<2x1xf32>
    %188 = vector.broadcast %187 : vector<2x1xf32> to vector<2x256xf32>
    %189 = arith.mulf %186, %188 : vector<2x256xf32>
    %190 = arith.addf %181, %189 : vector<2x256xf32>
    %c16_i32 = arith.constant 16 : i32
    %191 = tpu.dynamic_rotate %30 by %c16_i32 dim 1 : vector<2x256xf32>, i32 -> vector<2x256xf32>
    %192 = vector.extract_strided_slice %32 {offsets = [3, 0], sizes = [1, 256], strides = [1, 1]} : vector<7x256xf32> to vector<1x256xf32>
    %193 = arith.mulf %163, %192 : vector<1x256xf32>
    %194 = vector.broadcast %193 : vector<1x256xf32> to vector<2x256xf32>
    %195 = arith.mulf %191, %194 : vector<2x256xf32>
    %196 = vector.extract_strided_slice %33 {offsets = [0, 17], sizes = [2, 1], strides = [1, 1]} : vector<2x49xf32> to vector<2x1xf32>
    %197 = vector.broadcast %196 : vector<2x1xf32> to vector<2x256xf32>
    %198 = arith.mulf %195, %197 : vector<2x256xf32>
    %199 = arith.addf %190, %198 : vector<2x256xf32>
    %c15_i32 = arith.constant 15 : i32
    %200 = tpu.dynamic_rotate %30 by %c15_i32 dim 1 : vector<2x256xf32>, i32 -> vector<2x256xf32>
    %201 = vector.extract_strided_slice %32 {offsets = [4, 0], sizes = [1, 256], strides = [1, 1]} : vector<7x256xf32> to vector<1x256xf32>
    %202 = arith.mulf %163, %201 : vector<1x256xf32>
    %203 = vector.broadcast %202 : vector<1x256xf32> to vector<2x256xf32>
    %204 = arith.mulf %200, %203 : vector<2x256xf32>
    %205 = vector.extract_strided_slice %33 {offsets = [0, 18], sizes = [2, 1], strides = [1, 1]} : vector<2x49xf32> to vector<2x1xf32>
    %206 = vector.broadcast %205 : vector<2x1xf32> to vector<2x256xf32>
    %207 = arith.mulf %204, %206 : vector<2x256xf32>
    %208 = arith.addf %199, %207 : vector<2x256xf32>
    %c14_i32 = arith.constant 14 : i32
    %209 = tpu.dynamic_rotate %30 by %c14_i32 dim 1 : vector<2x256xf32>, i32 -> vector<2x256xf32>
    %210 = vector.extract_strided_slice %32 {offsets = [5, 0], sizes = [1, 256], strides = [1, 1]} : vector<7x256xf32> to vector<1x256xf32>
    %211 = arith.mulf %163, %210 : vector<1x256xf32>
    %212 = vector.broadcast %211 : vector<1x256xf32> to vector<2x256xf32>
    %213 = arith.mulf %209, %212 : vector<2x256xf32>
    %214 = vector.extract_strided_slice %33 {offsets = [0, 19], sizes = [2, 1], strides = [1, 1]} : vector<2x49xf32> to vector<2x1xf32>
    %215 = vector.broadcast %214 : vector<2x1xf32> to vector<2x256xf32>
    %216 = arith.mulf %213, %215 : vector<2x256xf32>
    %217 = arith.addf %208, %216 : vector<2x256xf32>
    %c13_i32 = arith.constant 13 : i32
    %218 = tpu.dynamic_rotate %30 by %c13_i32 dim 1 : vector<2x256xf32>, i32 -> vector<2x256xf32>
    %219 = vector.extract_strided_slice %32 {offsets = [6, 0], sizes = [1, 256], strides = [1, 1]} : vector<7x256xf32> to vector<1x256xf32>
    %220 = arith.mulf %163, %219 : vector<1x256xf32>
    %221 = vector.broadcast %220 : vector<1x256xf32> to vector<2x256xf32>
    %222 = arith.mulf %218, %221 : vector<2x256xf32>
    %223 = vector.extract_strided_slice %33 {offsets = [0, 20], sizes = [2, 1], strides = [1, 1]} : vector<2x49xf32> to vector<2x1xf32>
    %224 = vector.broadcast %223 : vector<2x1xf32> to vector<2x256xf32>
    %225 = arith.mulf %222, %224 : vector<2x256xf32>
    %226 = arith.addf %217, %225 : vector<2x256xf32>
    %227 = vector.extract_strided_slice %31 {offsets = [3, 0], sizes = [1, 256], strides = [1, 1]} : vector<7x256xf32> to vector<1x256xf32>
    %c3_i32 = arith.constant 3 : i32
    %228 = tpu.dynamic_rotate %30 by %c3_i32 dim 1 : vector<2x256xf32>, i32 -> vector<2x256xf32>
    %229 = vector.extract_strided_slice %32 {offsets = [0, 0], sizes = [1, 256], strides = [1, 1]} : vector<7x256xf32> to vector<1x256xf32>
    %230 = arith.mulf %227, %229 : vector<1x256xf32>
    %231 = vector.broadcast %230 : vector<1x256xf32> to vector<2x256xf32>
    %232 = arith.mulf %228, %231 : vector<2x256xf32>
    %233 = vector.extract_strided_slice %33 {offsets = [0, 21], sizes = [2, 1], strides = [1, 1]} : vector<2x49xf32> to vector<2x1xf32>
    %234 = vector.broadcast %233 : vector<2x1xf32> to vector<2x256xf32>
    %235 = arith.mulf %232, %234 : vector<2x256xf32>
    %236 = arith.addf %226, %235 : vector<2x256xf32>
    %c2_i32 = arith.constant 2 : i32
    %237 = tpu.dynamic_rotate %30 by %c2_i32 dim 1 : vector<2x256xf32>, i32 -> vector<2x256xf32>
    %238 = vector.extract_strided_slice %32 {offsets = [1, 0], sizes = [1, 256], strides = [1, 1]} : vector<7x256xf32> to vector<1x256xf32>
    %239 = arith.mulf %227, %238 : vector<1x256xf32>
    %240 = vector.broadcast %239 : vector<1x256xf32> to vector<2x256xf32>
    %241 = arith.mulf %237, %240 : vector<2x256xf32>
    %242 = vector.extract_strided_slice %33 {offsets = [0, 22], sizes = [2, 1], strides = [1, 1]} : vector<2x49xf32> to vector<2x1xf32>
    %243 = vector.broadcast %242 : vector<2x1xf32> to vector<2x256xf32>
    %244 = arith.mulf %241, %243 : vector<2x256xf32>
    %245 = arith.addf %236, %244 : vector<2x256xf32>
    %c1_i32 = arith.constant 1 : i32
    %246 = tpu.dynamic_rotate %30 by %c1_i32 dim 1 : vector<2x256xf32>, i32 -> vector<2x256xf32>
    %247 = vector.extract_strided_slice %32 {offsets = [2, 0], sizes = [1, 256], strides = [1, 1]} : vector<7x256xf32> to vector<1x256xf32>
    %248 = arith.mulf %227, %247 : vector<1x256xf32>
    %249 = vector.broadcast %248 : vector<1x256xf32> to vector<2x256xf32>
    %250 = arith.mulf %246, %249 : vector<2x256xf32>
    %251 = vector.extract_strided_slice %33 {offsets = [0, 23], sizes = [2, 1], strides = [1, 1]} : vector<2x49xf32> to vector<2x1xf32>
    %252 = vector.broadcast %251 : vector<2x1xf32> to vector<2x256xf32>
    %253 = arith.mulf %250, %252 : vector<2x256xf32>
    %254 = arith.addf %245, %253 : vector<2x256xf32>
    %255 = vector.extract_strided_slice %32 {offsets = [3, 0], sizes = [1, 256], strides = [1, 1]} : vector<7x256xf32> to vector<1x256xf32>
    %256 = arith.mulf %227, %255 : vector<1x256xf32>
    %257 = vector.broadcast %256 : vector<1x256xf32> to vector<2x256xf32>
    %258 = arith.mulf %30, %257 : vector<2x256xf32>
    %259 = vector.extract_strided_slice %33 {offsets = [0, 24], sizes = [2, 1], strides = [1, 1]} : vector<2x49xf32> to vector<2x1xf32>
    %260 = vector.broadcast %259 : vector<2x1xf32> to vector<2x256xf32>
    %261 = arith.mulf %258, %260 : vector<2x256xf32>
    %262 = arith.addf %254, %261 : vector<2x256xf32>
    %c255_i32 = arith.constant 255 : i32
    %263 = tpu.dynamic_rotate %30 by %c255_i32 dim 1 : vector<2x256xf32>, i32 -> vector<2x256xf32>
    %264 = vector.extract_strided_slice %32 {offsets = [4, 0], sizes = [1, 256], strides = [1, 1]} : vector<7x256xf32> to vector<1x256xf32>
    %265 = arith.mulf %227, %264 : vector<1x256xf32>
    %266 = vector.broadcast %265 : vector<1x256xf32> to vector<2x256xf32>
    %267 = arith.mulf %263, %266 : vector<2x256xf32>
    %268 = vector.extract_strided_slice %33 {offsets = [0, 25], sizes = [2, 1], strides = [1, 1]} : vector<2x49xf32> to vector<2x1xf32>
    %269 = vector.broadcast %268 : vector<2x1xf32> to vector<2x256xf32>
    %270 = arith.mulf %267, %269 : vector<2x256xf32>
    %271 = arith.addf %262, %270 : vector<2x256xf32>
    %c254_i32 = arith.constant 254 : i32
    %272 = tpu.dynamic_rotate %30 by %c254_i32 dim 1 : vector<2x256xf32>, i32 -> vector<2x256xf32>
    %273 = vector.extract_strided_slice %32 {offsets = [5, 0], sizes = [1, 256], strides = [1, 1]} : vector<7x256xf32> to vector<1x256xf32>
    %274 = arith.mulf %227, %273 : vector<1x256xf32>
    %275 = vector.broadcast %274 : vector<1x256xf32> to vector<2x256xf32>
    %276 = arith.mulf %272, %275 : vector<2x256xf32>
    %277 = vector.extract_strided_slice %33 {offsets = [0, 26], sizes = [2, 1], strides = [1, 1]} : vector<2x49xf32> to vector<2x1xf32>
    %278 = vector.broadcast %277 : vector<2x1xf32> to vector<2x256xf32>
    %279 = arith.mulf %276, %278 : vector<2x256xf32>
    %280 = arith.addf %271, %279 : vector<2x256xf32>
    %c253_i32 = arith.constant 253 : i32
    %281 = tpu.dynamic_rotate %30 by %c253_i32 dim 1 : vector<2x256xf32>, i32 -> vector<2x256xf32>
    %282 = vector.extract_strided_slice %32 {offsets = [6, 0], sizes = [1, 256], strides = [1, 1]} : vector<7x256xf32> to vector<1x256xf32>
    %283 = arith.mulf %227, %282 : vector<1x256xf32>
    %284 = vector.broadcast %283 : vector<1x256xf32> to vector<2x256xf32>
    %285 = arith.mulf %281, %284 : vector<2x256xf32>
    %286 = vector.extract_strided_slice %33 {offsets = [0, 27], sizes = [2, 1], strides = [1, 1]} : vector<2x49xf32> to vector<2x1xf32>
    %287 = vector.broadcast %286 : vector<2x1xf32> to vector<2x256xf32>
    %288 = arith.mulf %285, %287 : vector<2x256xf32>
    %289 = arith.addf %280, %288 : vector<2x256xf32>
    %290 = vector.extract_strided_slice %31 {offsets = [4, 0], sizes = [1, 256], strides = [1, 1]} : vector<7x256xf32> to vector<1x256xf32>
    %c243_i32 = arith.constant 243 : i32
    %291 = tpu.dynamic_rotate %30 by %c243_i32 dim 1 : vector<2x256xf32>, i32 -> vector<2x256xf32>
    %292 = vector.extract_strided_slice %32 {offsets = [0, 0], sizes = [1, 256], strides = [1, 1]} : vector<7x256xf32> to vector<1x256xf32>
    %293 = arith.mulf %290, %292 : vector<1x256xf32>
    %294 = vector.broadcast %293 : vector<1x256xf32> to vector<2x256xf32>
    %295 = arith.mulf %291, %294 : vector<2x256xf32>
    %296 = vector.extract_strided_slice %33 {offsets = [0, 28], sizes = [2, 1], strides = [1, 1]} : vector<2x49xf32> to vector<2x1xf32>
    %297 = vector.broadcast %296 : vector<2x1xf32> to vector<2x256xf32>
    %298 = arith.mulf %295, %297 : vector<2x256xf32>
    %299 = arith.addf %289, %298 : vector<2x256xf32>
    %c242_i32 = arith.constant 242 : i32
    %300 = tpu.dynamic_rotate %30 by %c242_i32 dim 1 : vector<2x256xf32>, i32 -> vector<2x256xf32>
    %301 = vector.extract_strided_slice %32 {offsets = [1, 0], sizes = [1, 256], strides = [1, 1]} : vector<7x256xf32> to vector<1x256xf32>
    %302 = arith.mulf %290, %301 : vector<1x256xf32>
    %303 = vector.broadcast %302 : vector<1x256xf32> to vector<2x256xf32>
    %304 = arith.mulf %300, %303 : vector<2x256xf32>
    %305 = vector.extract_strided_slice %33 {offsets = [0, 29], sizes = [2, 1], strides = [1, 1]} : vector<2x49xf32> to vector<2x1xf32>
    %306 = vector.broadcast %305 : vector<2x1xf32> to vector<2x256xf32>
    %307 = arith.mulf %304, %306 : vector<2x256xf32>
    %308 = arith.addf %299, %307 : vector<2x256xf32>
    %c241_i32 = arith.constant 241 : i32
    %309 = tpu.dynamic_rotate %30 by %c241_i32 dim 1 : vector<2x256xf32>, i32 -> vector<2x256xf32>
    %310 = vector.extract_strided_slice %32 {offsets = [2, 0], sizes = [1, 256], strides = [1, 1]} : vector<7x256xf32> to vector<1x256xf32>
    %311 = arith.mulf %290, %310 : vector<1x256xf32>
    %312 = vector.broadcast %311 : vector<1x256xf32> to vector<2x256xf32>
    %313 = arith.mulf %309, %312 : vector<2x256xf32>
    %314 = vector.extract_strided_slice %33 {offsets = [0, 30], sizes = [2, 1], strides = [1, 1]} : vector<2x49xf32> to vector<2x1xf32>
    %315 = vector.broadcast %314 : vector<2x1xf32> to vector<2x256xf32>
    %316 = arith.mulf %313, %315 : vector<2x256xf32>
    %317 = arith.addf %308, %316 : vector<2x256xf32>
    %c240_i32 = arith.constant 240 : i32
    %318 = tpu.dynamic_rotate %30 by %c240_i32 dim 1 : vector<2x256xf32>, i32 -> vector<2x256xf32>
    %319 = vector.extract_strided_slice %32 {offsets = [3, 0], sizes = [1, 256], strides = [1, 1]} : vector<7x256xf32> to vector<1x256xf32>
    %320 = arith.mulf %290, %319 : vector<1x256xf32>
    %321 = vector.broadcast %320 : vector<1x256xf32> to vector<2x256xf32>
    %322 = arith.mulf %318, %321 : vector<2x256xf32>
    %323 = vector.extract_strided_slice %33 {offsets = [0, 31], sizes = [2, 1], strides = [1, 1]} : vector<2x49xf32> to vector<2x1xf32>
    %324 = vector.broadcast %323 : vector<2x1xf32> to vector<2x256xf32>
    %325 = arith.mulf %322, %324 : vector<2x256xf32>
    %326 = arith.addf %317, %325 : vector<2x256xf32>
    %c239_i32 = arith.constant 239 : i32
    %327 = tpu.dynamic_rotate %30 by %c239_i32 dim 1 : vector<2x256xf32>, i32 -> vector<2x256xf32>
    %328 = vector.extract_strided_slice %32 {offsets = [4, 0], sizes = [1, 256], strides = [1, 1]} : vector<7x256xf32> to vector<1x256xf32>
    %329 = arith.mulf %290, %328 : vector<1x256xf32>
    %330 = vector.broadcast %329 : vector<1x256xf32> to vector<2x256xf32>
    %331 = arith.mulf %327, %330 : vector<2x256xf32>
    %332 = vector.extract_strided_slice %33 {offsets = [0, 32], sizes = [2, 1], strides = [1, 1]} : vector<2x49xf32> to vector<2x1xf32>
    %333 = vector.broadcast %332 : vector<2x1xf32> to vector<2x256xf32>
    %334 = arith.mulf %331, %333 : vector<2x256xf32>
    %335 = arith.addf %326, %334 : vector<2x256xf32>
    %c238_i32 = arith.constant 238 : i32
    %336 = tpu.dynamic_rotate %30 by %c238_i32 dim 1 : vector<2x256xf32>, i32 -> vector<2x256xf32>
    %337 = vector.extract_strided_slice %32 {offsets = [5, 0], sizes = [1, 256], strides = [1, 1]} : vector<7x256xf32> to vector<1x256xf32>
    %338 = arith.mulf %290, %337 : vector<1x256xf32>
    %339 = vector.broadcast %338 : vector<1x256xf32> to vector<2x256xf32>
    %340 = arith.mulf %336, %339 : vector<2x256xf32>
    %341 = vector.extract_strided_slice %33 {offsets = [0, 33], sizes = [2, 1], strides = [1, 1]} : vector<2x49xf32> to vector<2x1xf32>
    %342 = vector.broadcast %341 : vector<2x1xf32> to vector<2x256xf32>
    %343 = arith.mulf %340, %342 : vector<2x256xf32>
    %344 = arith.addf %335, %343 : vector<2x256xf32>
    %c237_i32 = arith.constant 237 : i32
    %345 = tpu.dynamic_rotate %30 by %c237_i32 dim 1 : vector<2x256xf32>, i32 -> vector<2x256xf32>
    %346 = vector.extract_strided_slice %32 {offsets = [6, 0], sizes = [1, 256], strides = [1, 1]} : vector<7x256xf32> to vector<1x256xf32>
    %347 = arith.mulf %290, %346 : vector<1x256xf32>
    %348 = vector.broadcast %347 : vector<1x256xf32> to vector<2x256xf32>
    %349 = arith.mulf %345, %348 : vector<2x256xf32>
    %350 = vector.extract_strided_slice %33 {offsets = [0, 34], sizes = [2, 1], strides = [1, 1]} : vector<2x49xf32> to vector<2x1xf32>
    %351 = vector.broadcast %350 : vector<2x1xf32> to vector<2x256xf32>
    %352 = arith.mulf %349, %351 : vector<2x256xf32>
    %353 = arith.addf %344, %352 : vector<2x256xf32>
    %354 = vector.extract_strided_slice %31 {offsets = [5, 0], sizes = [1, 256], strides = [1, 1]} : vector<7x256xf32> to vector<1x256xf32>
    %c227_i32 = arith.constant 227 : i32
    %355 = tpu.dynamic_rotate %30 by %c227_i32 dim 1 : vector<2x256xf32>, i32 -> vector<2x256xf32>
    %356 = vector.extract_strided_slice %32 {offsets = [0, 0], sizes = [1, 256], strides = [1, 1]} : vector<7x256xf32> to vector<1x256xf32>
    %357 = arith.mulf %354, %356 : vector<1x256xf32>
    %358 = vector.broadcast %357 : vector<1x256xf32> to vector<2x256xf32>
    %359 = arith.mulf %355, %358 : vector<2x256xf32>
    %360 = vector.extract_strided_slice %33 {offsets = [0, 35], sizes = [2, 1], strides = [1, 1]} : vector<2x49xf32> to vector<2x1xf32>
    %361 = vector.broadcast %360 : vector<2x1xf32> to vector<2x256xf32>
    %362 = arith.mulf %359, %361 : vector<2x256xf32>
    %363 = arith.addf %353, %362 : vector<2x256xf32>
    %c226_i32 = arith.constant 226 : i32
    %364 = tpu.dynamic_rotate %30 by %c226_i32 dim 1 : vector<2x256xf32>, i32 -> vector<2x256xf32>
    %365 = vector.extract_strided_slice %32 {offsets = [1, 0], sizes = [1, 256], strides = [1, 1]} : vector<7x256xf32> to vector<1x256xf32>
    %366 = arith.mulf %354, %365 : vector<1x256xf32>
    %367 = vector.broadcast %366 : vector<1x256xf32> to vector<2x256xf32>
    %368 = arith.mulf %364, %367 : vector<2x256xf32>
    %369 = vector.extract_strided_slice %33 {offsets = [0, 36], sizes = [2, 1], strides = [1, 1]} : vector<2x49xf32> to vector<2x1xf32>
    %370 = vector.broadcast %369 : vector<2x1xf32> to vector<2x256xf32>
    %371 = arith.mulf %368, %370 : vector<2x256xf32>
    %372 = arith.addf %363, %371 : vector<2x256xf32>
    %c225_i32 = arith.constant 225 : i32
    %373 = tpu.dynamic_rotate %30 by %c225_i32 dim 1 : vector<2x256xf32>, i32 -> vector<2x256xf32>
    %374 = vector.extract_strided_slice %32 {offsets = [2, 0], sizes = [1, 256], strides = [1, 1]} : vector<7x256xf32> to vector<1x256xf32>
    %375 = arith.mulf %354, %374 : vector<1x256xf32>
    %376 = vector.broadcast %375 : vector<1x256xf32> to vector<2x256xf32>
    %377 = arith.mulf %373, %376 : vector<2x256xf32>
    %378 = vector.extract_strided_slice %33 {offsets = [0, 37], sizes = [2, 1], strides = [1, 1]} : vector<2x49xf32> to vector<2x1xf32>
    %379 = vector.broadcast %378 : vector<2x1xf32> to vector<2x256xf32>
    %380 = arith.mulf %377, %379 : vector<2x256xf32>
    %381 = arith.addf %372, %380 : vector<2x256xf32>
    %c224_i32 = arith.constant 224 : i32
    %382 = tpu.dynamic_rotate %30 by %c224_i32 dim 1 : vector<2x256xf32>, i32 -> vector<2x256xf32>
    %383 = vector.extract_strided_slice %32 {offsets = [3, 0], sizes = [1, 256], strides = [1, 1]} : vector<7x256xf32> to vector<1x256xf32>
    %384 = arith.mulf %354, %383 : vector<1x256xf32>
    %385 = vector.broadcast %384 : vector<1x256xf32> to vector<2x256xf32>
    %386 = arith.mulf %382, %385 : vector<2x256xf32>
    %387 = vector.extract_strided_slice %33 {offsets = [0, 38], sizes = [2, 1], strides = [1, 1]} : vector<2x49xf32> to vector<2x1xf32>
    %388 = vector.broadcast %387 : vector<2x1xf32> to vector<2x256xf32>
    %389 = arith.mulf %386, %388 : vector<2x256xf32>
    %390 = arith.addf %381, %389 : vector<2x256xf32>
    %c223_i32 = arith.constant 223 : i32
    %391 = tpu.dynamic_rotate %30 by %c223_i32 dim 1 : vector<2x256xf32>, i32 -> vector<2x256xf32>
    %392 = vector.extract_strided_slice %32 {offsets = [4, 0], sizes = [1, 256], strides = [1, 1]} : vector<7x256xf32> to vector<1x256xf32>
    %393 = arith.mulf %354, %392 : vector<1x256xf32>
    %394 = vector.broadcast %393 : vector<1x256xf32> to vector<2x256xf32>
    %395 = arith.mulf %391, %394 : vector<2x256xf32>
    %396 = vector.extract_strided_slice %33 {offsets = [0, 39], sizes = [2, 1], strides = [1, 1]} : vector<2x49xf32> to vector<2x1xf32>
    %397 = vector.broadcast %396 : vector<2x1xf32> to vector<2x256xf32>
    %398 = arith.mulf %395, %397 : vector<2x256xf32>
    %399 = arith.addf %390, %398 : vector<2x256xf32>
    %c222_i32 = arith.constant 222 : i32
    %400 = tpu.dynamic_rotate %30 by %c222_i32 dim 1 : vector<2x256xf32>, i32 -> vector<2x256xf32>
    %401 = vector.extract_strided_slice %32 {offsets = [5, 0], sizes = [1, 256], strides = [1, 1]} : vector<7x256xf32> to vector<1x256xf32>
    %402 = arith.mulf %354, %401 : vector<1x256xf32>
    %403 = vector.broadcast %402 : vector<1x256xf32> to vector<2x256xf32>
    %404 = arith.mulf %400, %403 : vector<2x256xf32>
    %405 = vector.extract_strided_slice %33 {offsets = [0, 40], sizes = [2, 1], strides = [1, 1]} : vector<2x49xf32> to vector<2x1xf32>
    %406 = vector.broadcast %405 : vector<2x1xf32> to vector<2x256xf32>
    %407 = arith.mulf %404, %406 : vector<2x256xf32>
    %408 = arith.addf %399, %407 : vector<2x256xf32>
    %c221_i32 = arith.constant 221 : i32
    %409 = tpu.dynamic_rotate %30 by %c221_i32 dim 1 : vector<2x256xf32>, i32 -> vector<2x256xf32>
    %410 = vector.extract_strided_slice %32 {offsets = [6, 0], sizes = [1, 256], strides = [1, 1]} : vector<7x256xf32> to vector<1x256xf32>
    %411 = arith.mulf %354, %410 : vector<1x256xf32>
    %412 = vector.broadcast %411 : vector<1x256xf32> to vector<2x256xf32>
    %413 = arith.mulf %409, %412 : vector<2x256xf32>
    %414 = vector.extract_strided_slice %33 {offsets = [0, 41], sizes = [2, 1], strides = [1, 1]} : vector<2x49xf32> to vector<2x1xf32>
    %415 = vector.broadcast %414 : vector<2x1xf32> to vector<2x256xf32>
    %416 = arith.mulf %413, %415 : vector<2x256xf32>
    %417 = arith.addf %408, %416 : vector<2x256xf32>
    %418 = vector.extract_strided_slice %31 {offsets = [6, 0], sizes = [1, 256], strides = [1, 1]} : vector<7x256xf32> to vector<1x256xf32>
    %c211_i32 = arith.constant 211 : i32
    %419 = tpu.dynamic_rotate %30 by %c211_i32 dim 1 : vector<2x256xf32>, i32 -> vector<2x256xf32>
    %420 = vector.extract_strided_slice %32 {offsets = [0, 0], sizes = [1, 256], strides = [1, 1]} : vector<7x256xf32> to vector<1x256xf32>
    %421 = arith.mulf %418, %420 : vector<1x256xf32>
    %422 = vector.broadcast %421 : vector<1x256xf32> to vector<2x256xf32>
    %423 = arith.mulf %419, %422 : vector<2x256xf32>
    %424 = vector.extract_strided_slice %33 {offsets = [0, 42], sizes = [2, 1], strides = [1, 1]} : vector<2x49xf32> to vector<2x1xf32>
    %425 = vector.broadcast %424 : vector<2x1xf32> to vector<2x256xf32>
    %426 = arith.mulf %423, %425 : vector<2x256xf32>
    %427 = arith.addf %417, %426 : vector<2x256xf32>
    %c210_i32 = arith.constant 210 : i32
    %428 = tpu.dynamic_rotate %30 by %c210_i32 dim 1 : vector<2x256xf32>, i32 -> vector<2x256xf32>
    %429 = vector.extract_strided_slice %32 {offsets = [1, 0], sizes = [1, 256], strides = [1, 1]} : vector<7x256xf32> to vector<1x256xf32>
    %430 = arith.mulf %418, %429 : vector<1x256xf32>
    %431 = vector.broadcast %430 : vector<1x256xf32> to vector<2x256xf32>
    %432 = arith.mulf %428, %431 : vector<2x256xf32>
    %433 = vector.extract_strided_slice %33 {offsets = [0, 43], sizes = [2, 1], strides = [1, 1]} : vector<2x49xf32> to vector<2x1xf32>
    %434 = vector.broadcast %433 : vector<2x1xf32> to vector<2x256xf32>
    %435 = arith.mulf %432, %434 : vector<2x256xf32>
    %436 = arith.addf %427, %435 : vector<2x256xf32>
    %c209_i32 = arith.constant 209 : i32
    %437 = tpu.dynamic_rotate %30 by %c209_i32 dim 1 : vector<2x256xf32>, i32 -> vector<2x256xf32>
    %438 = vector.extract_strided_slice %32 {offsets = [2, 0], sizes = [1, 256], strides = [1, 1]} : vector<7x256xf32> to vector<1x256xf32>
    %439 = arith.mulf %418, %438 : vector<1x256xf32>
    %440 = vector.broadcast %439 : vector<1x256xf32> to vector<2x256xf32>
    %441 = arith.mulf %437, %440 : vector<2x256xf32>
    %442 = vector.extract_strided_slice %33 {offsets = [0, 44], sizes = [2, 1], strides = [1, 1]} : vector<2x49xf32> to vector<2x1xf32>
    %443 = vector.broadcast %442 : vector<2x1xf32> to vector<2x256xf32>
    %444 = arith.mulf %441, %443 : vector<2x256xf32>
    %445 = arith.addf %436, %444 : vector<2x256xf32>
    %c208_i32 = arith.constant 208 : i32
    %446 = tpu.dynamic_rotate %30 by %c208_i32 dim 1 : vector<2x256xf32>, i32 -> vector<2x256xf32>
    %447 = vector.extract_strided_slice %32 {offsets = [3, 0], sizes = [1, 256], strides = [1, 1]} : vector<7x256xf32> to vector<1x256xf32>
    %448 = arith.mulf %418, %447 : vector<1x256xf32>
    %449 = vector.broadcast %448 : vector<1x256xf32> to vector<2x256xf32>
    %450 = arith.mulf %446, %449 : vector<2x256xf32>
    %451 = vector.extract_strided_slice %33 {offsets = [0, 45], sizes = [2, 1], strides = [1, 1]} : vector<2x49xf32> to vector<2x1xf32>
    %452 = vector.broadcast %451 : vector<2x1xf32> to vector<2x256xf32>
    %453 = arith.mulf %450, %452 : vector<2x256xf32>
    %454 = arith.addf %445, %453 : vector<2x256xf32>
    %c207_i32 = arith.constant 207 : i32
    %455 = tpu.dynamic_rotate %30 by %c207_i32 dim 1 : vector<2x256xf32>, i32 -> vector<2x256xf32>
    %456 = vector.extract_strided_slice %32 {offsets = [4, 0], sizes = [1, 256], strides = [1, 1]} : vector<7x256xf32> to vector<1x256xf32>
    %457 = arith.mulf %418, %456 : vector<1x256xf32>
    %458 = vector.broadcast %457 : vector<1x256xf32> to vector<2x256xf32>
    %459 = arith.mulf %455, %458 : vector<2x256xf32>
    %460 = vector.extract_strided_slice %33 {offsets = [0, 46], sizes = [2, 1], strides = [1, 1]} : vector<2x49xf32> to vector<2x1xf32>
    %461 = vector.broadcast %460 : vector<2x1xf32> to vector<2x256xf32>
    %462 = arith.mulf %459, %461 : vector<2x256xf32>
    %463 = arith.addf %454, %462 : vector<2x256xf32>
    %c206_i32 = arith.constant 206 : i32
    %464 = tpu.dynamic_rotate %30 by %c206_i32 dim 1 : vector<2x256xf32>, i32 -> vector<2x256xf32>
    %465 = vector.extract_strided_slice %32 {offsets = [5, 0], sizes = [1, 256], strides = [1, 1]} : vector<7x256xf32> to vector<1x256xf32>
    %466 = arith.mulf %418, %465 : vector<1x256xf32>
    %467 = vector.broadcast %466 : vector<1x256xf32> to vector<2x256xf32>
    %468 = arith.mulf %464, %467 : vector<2x256xf32>
    %469 = vector.extract_strided_slice %33 {offsets = [0, 47], sizes = [2, 1], strides = [1, 1]} : vector<2x49xf32> to vector<2x1xf32>
    %470 = vector.broadcast %469 : vector<2x1xf32> to vector<2x256xf32>
    %471 = arith.mulf %468, %470 : vector<2x256xf32>
    %472 = arith.addf %463, %471 : vector<2x256xf32>
    %c205_i32 = arith.constant 205 : i32
    %473 = tpu.dynamic_rotate %30 by %c205_i32 dim 1 : vector<2x256xf32>, i32 -> vector<2x256xf32>
    %474 = vector.extract_strided_slice %32 {offsets = [6, 0], sizes = [1, 256], strides = [1, 1]} : vector<7x256xf32> to vector<1x256xf32>
    %475 = arith.mulf %418, %474 : vector<1x256xf32>
    %476 = vector.broadcast %475 : vector<1x256xf32> to vector<2x256xf32>
    %477 = arith.mulf %473, %476 : vector<2x256xf32>
    %478 = vector.extract_strided_slice %33 {offsets = [0, 48], sizes = [2, 1], strides = [1, 1]} : vector<2x49xf32> to vector<2x1xf32>
    %479 = vector.broadcast %478 : vector<2x1xf32> to vector<2x256xf32>
    %480 = arith.mulf %477, %479 : vector<2x256xf32>
    %481 = arith.addf %472, %480 : vector<2x256xf32>
    %cst_23 = arith.constant dense<0.000000e+00> : vector<256xf32>
    %482 = vector.multi_reduction <add>, %481, %cst_23 [0] : vector<2x256xf32> to vector<256xf32>
    %483 = vector.shape_cast %482 : vector<256xf32> to vector<1x256xf32>
    %484 = arith.negf %483 : vector<1x256xf32>
    %485 = math.exp %484 : vector<1x256xf32>
    %cst_24 = arith.constant 1.000000e+00 : f32
    %486 = vector.broadcast %cst_24 : f32 to vector<1x256xf32>
    %487 = arith.addf %486, %485 : vector<1x256xf32>
    %488 = arith.divf %486, %487 : vector<1x256xf32>
    %489 = vector.broadcast %488 : vector<1x256xf32> to vector<4x256xf32>
    %490 = arith.mulf %23, %489 : vector<4x256xf32>
    %c0_25 = arith.constant 0 : index
    %c0_26 = arith.constant 0 : index
    %c0_27 = arith.constant 0 : index
    %491 = vector.load %arg7[%c0_25, %c0_26, %c0_27] : memref<1x4x256xf32, #tpu.memory_space<vmem>>, vector<1x4x256xf32>
    %492 = vector.shape_cast %491 : vector<1x4x256xf32> to vector<4x256xf32>
    %493 = vector.shape_cast %490 : vector<4x256xf32> to vector<1x4x256xf32>
    tpu.vector_store %arg7[%c0_25, %c0_26, %c0_27], %493 {strides = array<i32>} : memref<1x4x256xf32, #tpu.memory_space<vmem>>, vector<1x4x256xf32>,
    return
  }
  func.func @transform_0(%arg0: i32) -> (i32, i32, i32) {
    %c0_i32 = arith.constant 0 : i32
    %c0_i32_0 = arith.constant 0 : i32
    %c0_i32_1 = arith.constant 0 : i32
    return %arg0, %c0_i32, %c0_i32_0 : i32, i32, i32
  }
  func.func @transform_1(%arg0: i32) -> (i32, i32) {
    %c0_i32 = arith.constant 0 : i32
    %c0_i32_0 = arith.constant 0 : i32
    %c0_i32_1 = arith.constant 0 : i32
    return %c0_i32, %c0_i32_0 : i32, i32
  }
  func.func @transform_2(%arg0: i32) -> (i32, i32) {
    %c0_i32 = arith.constant 0 : i32
    %c0_i32_0 = arith.constant 0 : i32
    %c0_i32_1 = arith.constant 0 : i32
    return %c0_i32, %c0_i32_0 : i32, i32
  }
  func.func @transform_3(%arg0: i32) -> (i32, i32) {
    %c0_i32 = arith.constant 0 : i32
    %c0_i32_0 = arith.constant 0 : i32
    %c0_i32_1 = arith.constant 0 : i32
    return %c0_i32, %c0_i32_0 : i32, i32
  }
  func.func @transform_4(%arg0: i32) -> (i32, i32) {
    %c0_i32 = arith.constant 0 : i32
    %c0_i32_0 = arith.constant 0 : i32
    %c0_i32_1 = arith.constant 0 : i32
    return %c0_i32, %c0_i32_0 : i32, i32
  }
  func.func @transform_5(%arg0: i32) -> (i32, i32) {
    %c0_i32 = arith.constant 0 : i32
    %c0_i32_0 = arith.constant 0 : i32
    %c0_i32_1 = arith.constant 0 : i32
    return %c0_i32, %c0_i32_0 : i32, i32
  }
  func.func @transform_6(%arg0: i32) -> (i32, i32, i32) {
    %c0_i32 = arith.constant 0 : i32
    %c0_i32_0 = arith.constant 0 : i32
    %c0_i32_1 = arith.constant 0 : i32
    return %arg0, %c0_i32, %c0_i32_0 : i32, i32, i32
  }
}

</mosaic_0001>

<bundles_post_ra>
// kernel: tpu_custom_call.1
= control target key start
LH: loop header
LB: loop body
LE: loop exit
PB: predicated region body
PF: predicated region fallthrough
CT: control target
= control target key end

     0   :  { %11 = vsyncpa [#allocation3], 0  ;;  %s3023_s0 = inlined_call_operand.hbm [shape: f32[2,4,256], index: 0, kind: input, shape index: {}]   ;;  %s3024_s1 = inlined_call_operand.vmem [shape: f32[2,4], index: 1, kind: input, shape index: {}]   ;;  %s3025_s2 = inlined_call_operand.vmem [shape: f32[4,2], index: 2, kind: input, shape index: {}]   ;;  %s3026_s3 = inlined_call_operand.vmem [shape: f32[2,49], index: 3, kind: input, shape index: {}]   ;;  %s3027_s4 = inlined_call_operand.hbm [shape: f32[7,256], index: 4, kind: input, shape index: {}]   ;;  %s3028_s5 = inlined_call_operand.hbm [shape: f32[7,256], index: 5, kind: input, shape index: {}]   ;;  %s3029_s6 = inlined_call_operand.hbm [shape: f32[2,4,256], index: 6, kind: output, shape index: {}]  }
   0x1   :  { %13 = vsyncpa [#allocation3 + $0x1], 0 }
   0x2   :  { %14 = vsyncpa [#allocation6], 0 }
   0x3   :  { %15 = vsyncpa [#allocation4], 0 }
   0x4   :  { %17 = vsyncpa [#allocation4 + $0x1], 0  ;;  %s2174_s21 = smov 0   ;;  %s2176_s22 = smov 0  }
   0x5   :  { %s2178_s23 = smov 0   ;;  %s2180_s24 = smov 0  }
   0x6 LB: > { %s2195_s25 = sadd.s32 4294967295, %s2035_s24   ;;  %s1614_s26 = sadd.s32 4294967294, %s2035_s24   ;;  %s2035_s24 = sphi %s2180_s24, %s3104_s24   ;;  %s2031_s23 = sphi %s2178_s23, %s3103_s23   ;;  %s2027_s22 = sphi %s2176_s22, %s3102_s22   ;;  %s2023_s21 = sphi %s2174_s21, %s3101_s21  }
   0x7   : > { %p43_p0 = scmp.ne.s32.totalorder %s2027_s22, %s2023_s21  ;;  %p44_p1 = scmp.eq.s32.totalorder %s2195_s25, 0 }
   0x8   : > { %p172_p2 = scmp.eq.s32.totalorder %s2195_s25, 1  ;;  %p178_p3 = scmp.eq.s32.totalorder %s1614_s26, 1 }
   0x9   : > { %p2204_p4 = por %p44_p1, %p43_p0  ;;  %p1615_p5 = scmp.ge.s32.totalorder %s2035_s24, 1 }
   0xa   : > { %p2209_p6 = por %p178_p3, %p43_p0  ;;  %p185_p7 = scmp.lt.s32.totalorder %s2035_s24, 3 }
   0xb   : > { %s206_s7 = sshll.u32 %s3027_s4, 4  ;;  %s2037_s9 = smov [#allocation5]   ;;  %s207_s7 = int_to_ptr.hbm [resolvable:$true] %s206_s7 }
   0xc   : > { %p2217_p8 = pnand %p1615_p5, %p185_p7  ;;  %s208_s10 = sshll.u32 %s2037_s9, 4  ;;  %s209_s10 = int_to_ptr.vmem [resolvable:$true] %s208_s10 }
   0xd   : > { %s218_s13 = sshll.u32 %s3028_s5, 4  ;;  %s2038_s14 = smov [#allocation7]   ;;  %s219_s13 = int_to_ptr.hbm [resolvable:$true] %s218_s13 }
   0xe   : > { %p1653_p10 = pneg %p2217_p8  ;;  %s220_s15 = sshll.u32 %s2038_s14, 4  ;;  %s221_s15 = int_to_ptr.vmem [resolvable:$true] %s220_s15 }
   0xf   : > { %s2230_s16 = sadd.s32 1, %s2035_s24   ;;  %s30_s17 = sadd.s32 1, %s2031_s23 }
  0x10   : > { %p1654_p11 = pnand %p1653_p10, %p44_p1  ;;  %s27_s18 = ssub.s32 %s2035_s24, %s2230_s16 }
  0x11   : > { %p37_p12 = scmp.ne.s32.totalorder %s2031_s23, %s2027_s22  ;;  %p28_p13 = scmp.eq.s32.totalorder %s27_s18, 0 }
  0x12   : > { %1656 = dma.hbm_to_vmem [thread:$0]  (!%p1654_p11), %s207_s7, 256, %s209_s10, [#allocation6]  }
  0x13   : > { %1659 = dma.hbm_to_vmem [thread:$0]  (!%p1654_p11), %s219_s13, 256, %s221_s15, [#allocation6]  }
  0x14   : > { %p38_p0 = scmp.eq.s32.totalorder %s2035_s24, 0  ;;  %p2240_p3 = por %p172_p2, %p37_p12 }
  0x15   : > { %p1670_p5 = scmp.lt.s32.totalorder %s2035_s24, 2  ;;  %s231_s26 = sand.u32 1, %s2031_s23  }
  0x16   : > { %s2246_s20 = scalar_select %p28_p13, %s2031_s23, %s30_s17  }
  0x17   : > { %p39_p7 = por %p38_p0, %p37_p12  ;;  %s1619_s29 = sshll.u32 %s231_s26, 3 }
  0x18   : > { %s1639_s30 = sshll.u32 %s2035_s24, 3  ;;  %s235_s11 = scalar_lea.vmem [#allocation2], %s1619_s29 }
  0x19   : > { %s240_s10 = scalar_lea.hbm %s3023_s0, %s1639_s30  ;;  %s244_s12 = sshll.u32 %s235_s11, 4  ;;  %s245_s12 = int_to_ptr.vmem [resolvable:$true] %s244_s12 }
  0x1a   : > { %s242_s13 = sshll.u32 %s240_s10, 4  ;;  %p2253_p2 = pnand %p1670_p5, %p39_p7  ;;  %s243_s13 = int_to_ptr.hbm [resolvable:$true] %s242_s13 }
  0x1b   : > { %s232_s15 = scalar_lea.sflag [#allocation3], %s231_s26  ;;  %s1935_s17 = sshra.s32 %s243_s13, 4  ;;  %s1936_s17 = int_to_ptr.hbm [resolvable:$true] %s1935_s17 }
  0x1c   : > { %s1937_s18 = scalar_lea.hbm %s1936_s17, 8  ;;  %p1939_p11 = pneg %p2253_p2 }
  0x1d   : > { %p1938_p10 = scmp.ne.s32.totalorder %s1936_s17, %s1937_s18  ;;  %s1942_s7 = scalar_lea.hbm %s3023_s0, 16 }
  0x1e   : > { %p1943_p0 = scmp.lt.s32.totalorder %s1936_s17, %s3023_s0  ;;  %p1944_p5 = scmp.lt.s32.totalorder %s1942_s7, %s1937_s18 }
  0x1f   : > { %p1940_p12 = pnand %p1939_p11, %p1938_p10 }
  0x20   : > { %p1945_p7 = por %p1944_p5, %p1943_p0 }
  0x21   : > { %p1941_p13 = pneg %p1940_p12 }
  0x23   : > { %p1946_p9 = pnand %p1945_p7, %p1941_p13 }
  0x25   : > { %1949 = shalt.err (!%p1946_p9)
}
  0x26   : > { %1663 = dma.hbm_to_vmem [thread:$0]  (!%p2253_p2), %s243_s13, 128, %s245_s12, %s232_s15  }
  0x27   : > { %253 = sbr.rel (%p2217_p8) target bundleno = 1147 (0x47b), region = 44 }
  0x2c   : > { %s2270_s26 = sand.u32 1, %s2027_s22  }
  0x2d   : > { %s3030_s11 = sshll.u32 %s2270_s26, 3  ;;  %s256_s30 = scalar_lea.sflag [#allocation3], %s2270_s26 }
  0x2e   : > { %s259_s17 = scalar_lea.vmem [#allocation2], %s3030_s11 }
  0x2f   : > { %2010 = dma.done.wait (%p2204_p4), %s256_s30, 128  }
  0x30   : > { %2012 = vsyncadd (%p2204_p4), %s256_s30, 4294967168 }
  0x31   : > { %2014 = dma.done.wait (%p44_p1), [#allocation6], 512  }
  0x32   : > { %2016 = vsyncadd (%p44_p1), [#allocation6], 4294966784  ;;  %v2284_v0 = vld [vmem:[%s259_s17] sm:$0xff]  ;;  %vm306_vm0 = vcmask 1043456   ;;  %v2039_v11 = vmov 256.0   ;;  %v2040_v13 = vmov 24  }
  0x33   : > { %301 = vst [vmem:[#allocation1] ss:$2 sm:$0xff] %v2284_v0  ;;  %1858 = vrcp.f32 %v2039_v11  ;;  %v2295_v12 = vld [vmem:[%s3026_s3] sm:$0x3]  ;;  %1832 = vset.pattern.permute.xlu1 %v2040_v13  ;;  %v2041_v16 = vmov 25   ;;  %v2042_v19 = vmov 26  }
  0x34   : > { %986 = vperm.xlu1 %1832, %v2295_v12   ;;  %vm330_vm2 = vcmask 7168   ;;  %v2043_v24 = vmov 27   ;;  %v332_v26 = vld [vmem:[%s3024_s1] sm:$0x3]  ;;  %vm333_vm3 = vcmask 31744   ;;  %v2044_v28 = vmov 28  }
  0x35   : > { %v2045_v29 = vmov 29   ;;  %v2046_v30 = vmov 30   ;;  %v2047_v31 = vmov 31   ;;  %v2048_v32 = vmov 0   ;;  %v361_v38 = vld [vmem:[%s3025_s2] sm:$0xf] }
  0x36   : > { %1808 = vset.pattern.permute.xlu2 %v2048_v32  ;;  %v2049_v33 = vmov 32   ;;  %v2050_v34 = vmov 1   ;;  %vm366_vm4 = vcmask 1041408   ;;  %v2051_v36 = vmov 33   ;;  %s2087_s18 = smov 51   ;;  %s2088_s29 = smov 50  }
  0x37   : > { %493 = vperm.xlu2 %1808, %v2295_v12   ;;  %vm362_vm5 = vcmask 15360   ;;  %v2052_v39 = vmov 3   ;;  %v2053_v40 = vmov 34   ;;  %v2054_v41 = vmov 4   ;;  %s2089_s7 = smov 47   ;;  %s2090_s9 = smov 49  }
  0x38   : > { %v2055_v42 = vmov 35   ;;  %v2056_v43 = vmov 5   ;;  %v2057_v44 = vmov 36   ;;  %v2058_v45 = vmov 6   ;;  %s2091_s10 = smov 46   ;;  %s2092_s30 = smov 48  }
  0x39   : > { %v1859_v14 = vpop.eup %1858  ;;  %v2059_v46 = vmov 37   ;;  %v2060_v47 = vmov 7   ;;  %v2061_v48 = vmov 38   ;;  %v2062_v49 = vmov 8   ;;  %s2093_s17 = smov 45   ;;  %s2094_s27 = smov 127  }
  0x3a   : > { %v302_v1 = vld.sshfl [vmem:[#allocation1] sm:$0xff pattern:$0x75316420]  ;;  %v303_v2 = vld.sshfl [vmem:[#allocation1 + $0x8] sm:$0xff pattern:$0x75316420]  ;;  %vm317_vm1 = vweird.f32 %v1859_v14 }
  0x3b   : > { %v307_v3 = vsel %vm306_vm0, %v302_v1, 0.0  ;;  %v308_v4 = vsel %vm306_vm0, %v303_v2, 0.0  ;;  %320 = vst [vmem:[#allocation1] ss:$2 sm:$0xff] %v2284_v0  ;;  %v313_v15 = vmul.f32 256.0, %v1859_v14  ;;  %v2063_v50 = vmov 39  }
  0x3c   : > { %v309_v5 = vadd.f32 %v308_v4, %v307_v3  ;;  %1833 = vset.pattern.permute.xlu1 %v2041_v16  ;;  %v2064_v51 = vmov 9   ;;  %v2065_v54 = vmov 10   ;;  %v2066_v56 = vmov 11   ;;  %s2095_s8 = smov 35   ;;  %s2096_s12 = smov 126  }
  0x3d   : > { %1005 = vperm.xlu1 %1833, %v2295_v12   ;;  %v314_v17 = vsub.f32 1.0, %v313_v15  ;;  %v2067_v58 = vmov 12   ;;  %vm390_vm6 = vcmask 11264   ;;  %v2068_v59 = vmov 13   ;;  %s2097_s13 = smov 34   ;;  %s2098_s14 = smov 125  }
  0x3e   : > { %310 = vadd.xlane.f32.xlu0 %v309_v5  ;;  %v2069_v1 = vmov 14   ;;  %v2070_v4 = vmov 15   ;;  %v2079_v32 = vmov 40   ;;  %vm468_vm12 = vcmask 1040384   ;;  %s2099_s15 = smov 33   ;;  %s2111_s11 = smov 18  }
  0x3f   : > { %v315_v18 = vmul.f32 %v1859_v14, %v314_v17  ;;  %1809 = vset.pattern.permute.xlu2 %v2050_v34  ;;  %v2074_v17 = vmov 19  }
  0x40   : > { %520 = vperm.xlu2 %1809, %v2295_v12  }
  0x41   : > { %v316_v20 = vadd.f32 %v1859_v14, %v315_v18 }
  0x42   : > { %v321_v6 = vld.sshfl [vmem:[#allocation1] sm:$0xff pattern:$0x75316420]  ;;  %v322_v7 = vld.sshfl [vmem:[#allocation1 + $0x8] sm:$0xff pattern:$0x75316420] }
  0x43   : > { %v325_v8 = vsel %vm306_vm0, %v321_v6, -inf  ;;  %v326_v9 = vsel %vm306_vm0, %v322_v7, -inf  ;;  %v318_v22 = vsel %vm317_vm1, %v1859_v14, %v316_v20  ;;  %v2071_v7 = vmov 16  }
  0x44   : > { %v327_v10 = vmax.f32 %v325_v8, %v326_v9  ;;  %v2073_v14 = vmov 18   ;;  %v2075_v20 = vmov 20  }
  0x45   : > { %1834 = vset.pattern.permute.xlu1 %v2042_v19 }
  0x46   : > { %328 = vmax.xlane.f32.xlu0 %v327_v10  ;;  %1024 = vperm.xlu1 %1834, %v2295_v12   ;;  %v2072_v10 = vmov 17  }
  0x48   : > { %1811 = vset.pattern.permute.xlu2 %v2052_v39  ;;  %v2081_v39 = vmov 42  }
  0x49   : > { %570 = vperm.xlu2 %1811, %v2295_v12  }
  0x4e   : > { %1835 = vset.pattern.permute.xlu1 %v2043_v24 }
  0x4f   : > { %1043 = vperm.xlu1 %1835, %v2295_v12  }
  0x51   : > { %1812 = vset.pattern.permute.xlu2 %v2054_v41 }
  0x52   : > { %595 = vperm.xlu2 %1812, %v2295_v12  }
  0x57   : > { %1836 = vset.pattern.permute.xlu1 %v2044_v28 }
  0x58   : > { %1062 = vperm.xlu1 %1836, %v2295_v12  }
  0x5a   : > { %1813 = vset.pattern.permute.xlu2 %v2056_v43  ;;  %v2082_v43 = vmov 43  }
  0x5b   : > { %620 = vperm.xlu2 %1813, %v2295_v12  }
  0x60   : > { %1837 = vset.pattern.permute.xlu1 %v2045_v29  ;;  %v2078_v29 = vmov 23  }
  0x61   : > { %1081 = vperm.xlu1 %1837, %v2295_v12  }
  0x63   : > { %1814 = vset.pattern.permute.xlu2 %v2058_v45 }
  0x64   : > { %645 = vperm.xlu2 %1814, %v2295_v12  }
  0x69   : > { %1838 = vset.pattern.permute.xlu1 %v2046_v30 }
  0x6a   : > { %1100 = vperm.xlu1 %1838, %v2295_v12  }
  0x6c   : > { %1815 = vset.pattern.permute.xlu2 %v2060_v47 }
  0x6d   : > { %670 = vperm.xlu2 %1815, %v2295_v12  }
  0x72   : > { %1839 = vset.pattern.permute.xlu1 %v2047_v31 }
  0x73   : > { %1119 = vperm.xlu1 %1839, %v2295_v12  }
  0x75   : > { %1816 = vset.pattern.permute.xlu2 %v2062_v49 }
  0x76   : > { %689 = vperm.xlu2 %1816, %v2295_v12  }
  0x7b   : > { %1840 = vset.pattern.permute.xlu1 %v2049_v33 }
  0x7c   : > { %1138 = vperm.xlu1 %1840, %v2295_v12  }
  0x7e   : > { %1817 = vset.pattern.permute.xlu2 %v2064_v51 }
  0x7f   : > { %708 = vperm.xlu2 %1817, %v2295_v12  }
  0x84   : > { %1841 = vset.pattern.permute.xlu1 %v2051_v36 }
  0x85   : > { %1157 = vperm.xlu1 %1841, %v2295_v12  }
  0x87   : > { %1818 = vset.pattern.permute.xlu2 %v2065_v54 }
  0x88   : > { %727 = vperm.xlu2 %1818, %v2295_v12  }
  0x8d   : > { %1842 = vset.pattern.permute.xlu1 %v2053_v40 }
  0x8e   : > { %1176 = vperm.xlu1 %1842, %v2295_v12  }
  0x90   : > { %1819 = vset.pattern.permute.xlu2 %v2066_v56  ;;  %v2085_v56 = vmov 44  }
  0x91   : > { %746 = vperm.xlu2 %1819, %v2295_v12   ;;  %v2344_v63 = vpop.permute.xlu2 %493 }
  0x96   : > { %1843 = vset.pattern.permute.xlu1 %v2055_v42 }
  0x97   : > { %1195 = vperm.xlu1 %1843, %v2295_v12  }
  0x99   : > { %1820 = vset.pattern.permute.xlu2 %v2067_v58 }
  0x9a   : > { %765 = vperm.xlu2 %1820, %v2295_v12   ;;  %v2349_v3 = vpop.permute.xlu2 %520 }
  0x9f   : > { %1844 = vset.pattern.permute.xlu1 %v2057_v44 }
  0xa0   : > { %1214 = vperm.xlu1 %1844, %v2295_v12  }
  0xa2   : > { %1821 = vset.pattern.permute.xlu2 %v2068_v59 }
  0xa3   : > { %784 = vperm.xlu2 %1821, %v2295_v12   ;;  %v2354_v6 = vpop.permute.xlu2 %570 }
  0xa6   : > { %v2330_v52 = vpop.permute.xlu1 %986 }
  0xa8   : > { %1845 = vset.pattern.permute.xlu1 %v2059_v46  ;;  %v2083_v46 = vmov 839922192  }
  0xa9   : > { %1233 = vperm.xlu1 %1845, %v2295_v12   ;;  %v415_v47 = vunpack.c.l.s4 %v2083_v46 }
  0xab   : > { %1822 = vset.pattern.permute.xlu2 %v2069_v1  ;;  %v416_v59 = vunpack.c.0.s8 %v415_v47 }
  0xac   : > { %803 = vperm.xlu2 %1822, %v2295_v12   ;;  %v2359_v9 = vpop.permute.xlu2 %595 }
  0xaf   : > { %v2332_v53 = vpop.permute.xlu1 %1005 }
  0xb1   : > { %v311_v21 = vpop.xlane.xlu0 %310  ;;  %1846 = vset.pattern.permute.xlu1 %v2061_v48 }
  0xb2   : > { %v319_v23 = vmul.f32 %v318_v22, %v311_v21  ;;  %1252 = vperm.xlu1 %1846, %v2295_v12   ;;  %v2076_v22 = vmov 21  }
  0xb4   : > { %1823 = vset.pattern.permute.xlu2 %v2070_v4 }
  0xb5   : > { %822 = vperm.xlu2 %1823, %v2295_v12   ;;  %v2364_v13 = vpop.permute.xlu2 %620 }
  0xb8   : > { %v2335_v55 = vpop.permute.xlu1 %1024 }
  0xb9   : > { %v329_v25 = vpop.xlane.xlu0 %328 }
  0xba   : > { %v331_v27 = vsel %vm330_vm2, %v319_v23, %v329_v25  ;;  %1847 = vset.pattern.permute.xlu1 %v2063_v50  ;;  %v2077_v25 = vmov 22   ;;  %v2084_v50 = vmov 2  }
  0xbb   : > { %1627 = vmatpush.msk.msra.mxu0 %vm306_vm0, %v331_v27  ;;  %1271 = vperm.xlu1 %1847, %v2295_v12  }
  0xbc   : > { %1628 = vmatmul.msk.f32.vlgmr.msra.gmra.mxu0 %vm333_vm3, %v332_v26  ;;  %1810 = vset.pattern.permute.xlu0 %v2084_v50 }
  0xbd   : > { %1824 = vset.pattern.permute.xlu2 %v2071_v7  ;;  %545 = vperm.xlu0 %1810, %v2295_v12  }
  0xbe   : > { %841 = vperm.xlu2 %1824, %v2295_v12   ;;  %v2369_v16 = vpop.permute.xlu2 %645 }
  0xc1   : > { %v2338_v57 = vpop.permute.xlu1 %1043 }
  0xc6   : > { %1825 = vset.pattern.permute.xlu2 %v2072_v10 }
  0xc7   : > { %860 = vperm.xlu2 %1825, %v2295_v12   ;;  %v2374_v19 = vpop.permute.xlu2 %670 }
  0xca   : > { %v2341_v60 = vpop.permute.xlu1 %1062 }
  0xcf   : > { %1826 = vset.pattern.permute.xlu2 %v2073_v14  ;;  %v2086_v14 = vmov 4.0  }
  0xd0   : > { %879 = vperm.xlu2 %1826, %v2295_v12   ;;  %v2379_v23 = vpop.permute.xlu2 %689 }
  0xd3   : > { %v2347_v2 = vpop.permute.xlu1 %1081 }
  0xd4   : > { %3058 = vst [vmem:[#allocation12_spill] sm:$0xff] %v2347_v2 }
  0xd8   : > { %1827 = vset.pattern.permute.xlu2 %v2074_v17 }
  0xd9   : > { %898 = vperm.xlu2 %1827, %v2295_v12   ;;  %v2385_v26 = vpop.permute.xlu2 %708 }
  0xdc   : > { %v2352_v5 = vpop.permute.xlu1 %1100 }
  0xdd   : > { %3059 = vst [vmem:[#allocation13_spill] sm:$0xff] %v2352_v5 }
  0xe1   : > { %1828 = vset.pattern.permute.xlu2 %v2075_v20 }
  0xe2   : > { %917 = vperm.xlu2 %1828, %v2295_v12   ;;  %v2389_v28 = vpop.permute.xlu2 %727 }
  0xe5   : > { %v2357_v8 = vpop.permute.xlu1 %1119 }
  0xe6   : > { %3060 = vst [vmem:[#allocation14_spill] sm:$0xff] %v2357_v8 }
  0xea   : > { %1829 = vset.pattern.permute.xlu2 %v2076_v22 }
  0xeb   : > { %936 = vperm.xlu2 %1829, %v2295_v12   ;;  %v2394_v31 = vpop.permute.xlu2 %746 }
  0xee   : > { %v2362_v11 = vpop.permute.xlu1 %1138 }
  0xef   : > { %3061 = vst [vmem:[#allocation15_spill] sm:$0xff] %v2362_v11 }
  0xf3   : > { %1830 = vset.pattern.permute.xlu2 %v2077_v25 }
  0xf4   : > { %955 = vperm.xlu2 %1830, %v2295_v12   ;;  %v2399_v34 = vpop.permute.xlu2 %765 }
  0xf7   : > { %v2367_v15 = vpop.permute.xlu1 %1157 }
  0xf8   : > { %3062 = vst [vmem:[#allocation16_spill] sm:$0xff] %v2367_v15 }
  0xfc   : > { %1831 = vset.pattern.permute.xlu2 %v2078_v29 }
  0xfd   : > { %974 = vperm.xlu2 %1831, %v2295_v12  }
 0x100   : > { %v2372_v18 = vpop.permute.xlu1 %1176 }
 0x101   : > { %3063 = vst [vmem:[#allocation17_spill] sm:$0xff] %v2372_v18 }
 0x105   : > { %1848 = vset.pattern.permute.xlu2 %v2079_v32 }
 0x106   : > { %1290 = vperm.xlu2 %1848, %v2295_v12  }
 0x109   : > { %v2377_v21 = vpop.permute.xlu1 %1195 }
 0x10a   : > { %3064 = vst [vmem:[#allocation18_spill] sm:$0xff] %v2377_v21 }
 0x112   : > { %v2382_v24 = vpop.permute.xlu1 %1214 }
 0x113   : > { %3065 = vst [vmem:[#allocation19_spill] sm:$0xff] %v2382_v24 }
 0x11b   : > { %v2387_v27 = vpop.permute.xlu1 %1233 }
 0x11c   : > { %3066 = vst [vmem:[#allocation20_spill] sm:$0xff] %v2387_v27 }
 0x124   : > { %v2392_v30 = vpop.permute.xlu1 %1252 }
 0x125   : > { %3067 = vst [vmem:[#allocation21_spill] sm:$0xff] %v2392_v30 }
 0x12d   : > { %v2397_v33 = vpop.permute.xlu1 %1271 }
 0x12e   : > { %3068 = vst [vmem:[#allocation22_spill] sm:$0xff] %v2397_v33 }
 0x139   : > { %v357_v35 = vpop.f32.mrf.mxu0 }
 0x13a   : > { %v360_v37 = vmax.f32 %v357_v35, 0.0  ;;  %v2080_v35 = vmov 41  }
 0x13b   : > { %1849 = vset.pattern.permute.xlu2 %v2080_v35 }
 0x13c   : > { %1629 = vmatpush.msk.msra.mxu1 %vm366_vm4, %v360_v37  ;;  %1309 = vperm.xlu2 %1849, %v2295_v12  }
 0x13d   : > { %1630 = vmatmul.msk.f32.vlgmr.msra.gmra.mxu1 %vm362_vm5, %v361_v38  ;;  %v2402_v38 = vpop.permute.xlu2 %784 }
 0x144   : > { %1850 = vset.pattern.permute.xlu2 %v2081_v39 }
 0x145   : > { %1328 = vperm.xlu2 %1850, %v2295_v12   ;;  %v2405_v42 = vpop.permute.xlu2 %803 }
 0x14d   : > { %1851 = vset.pattern.permute.xlu2 %v2082_v43  ;;  %v2409_v58 = vpop.permute.xlu2 %822 }
 0x14e   : > { %1347 = vperm.xlu2 %1851, %v2295_v12  }
 0x155   : > { %v2416_v17 = vpop.permute.xlu2 %841 }
 0x156   : > { %1852 = vset.pattern.permute.xlu2 %v2085_v56 }
 0x157   : > { %1366 = vperm.xlu2 %1852, %v2295_v12  }
 0x15d   : > { %v2421_v39 = vpop.permute.xlu2 %860 }
 0x1ba   : > { %v387_v61 = vpop.f32.mrf.mxu1 }
 0x1bb   : > { %v391_v62 = vsel %vm390_vm6, %v387_v61, 0.0 }
 0x1bc   : > { %392 = vadd.xlane.f32.xlu1 %v391_v62 }
 0x22f   : > { %v393_v36 = vpop.xlane.xlu1 %392 }
 0x230   : > { %v1631_v37 = vmul.f32 -1.442695, %v393_v36 }
 0x232   : > { %1860 = vpow2.f32 %v1631_v37 }
 0x238   : > { %v1861_v40 = vpop.eup %1860 }
 0x239   : > { %v397_v41 = vadd.f32 1.0, %v1861_v40 }
 0x23b   : > { %1862 = vrcp.f32 %v397_v41  ;;  %v409_v49 = vand.u32 2147483648, %v397_v41  ;;  %v407_v54 = vand.u32 2147483647, %v397_v41  ;;  %vm403_vm8 = vweird.f32 %v397_v41 }
 0x23c   : > { %1864 = vrcp.f32 %v2086_v14  ;;  %v2425_v14 = vpop.permute.xlu2 %879 }
 0x23d   : > { %v410_v62 = vor.u32 1.1754944e-38, %v409_v49  ;;  %vm408_vm10 = vcmp.eq.f32.partialorder %v407_v54, 8.507059e+37 }
 0x241   : > { %v1863_v44 = vpop.eup %1862 }
 0x242   : > { %v399_v45 = vmul.f32 %v1863_v44, %v397_v41  ;;  %vm404_vm7 = vweird.f32 %v1863_v44  ;;  %v1865_v20 = vpop.eup %1864 }
 0x243   : > { %vm405_vm9 = vmor %vm403_vm8, %vm404_vm7  ;;  %v441_v25 = vmul.f32 4.0, %v1865_v20  ;;  %vm445_vm11 = vweird.f32 %v1865_v20 }
 0x244   : > { %v400_v48 = vsub.f32 1.0, %v399_v45 }
 0x245   : > { %v442_v40 = vsub.f32 1.0, %v441_v25 }
 0x246   : > { %v401_v51 = vmul.f32 %v1863_v44, %v400_v48 }
 0x247   : > { %v443_v48 = vmul.f32 %v1865_v20, %v442_v40 }
 0x248   : > { %v402_v61 = vadd.f32 %v1863_v44, %v401_v51 }
 0x24a   : > { %v406_v1 = vsel %vm405_vm9, %v1863_v44, %v402_v61 }
 0x24b   : > { %v411_v4 = vsel %vm408_vm10, %v410_v62, %v406_v1  ;;  %v444_v1 = vadd.f32 %v1865_v20, %v443_v48 }
 0x24c   : > { %v417_v7 = vperm.slane %v411_v4, %v416_v59 }
 0x24e   : > { %v2413_v10 = vmul.f32 %v417_v7, %v2284_v0 }
 0x250   : > { %3069 = vst [vmem:[#allocation23_spill] sm:$0xff] %v2413_v10 }
 0x251   : > { %421 = vst [vmem:[#allocation1] ss:$2 sm:$0xff] %v2413_v10 }
 0x258   : > { %v422_v12 = vld.sshfl [vmem:[#allocation1] sm:$0xff pattern:$0x75316420]  ;;  %v423_v22 = vld.sshfl [vmem:[#allocation1 + $0x8] sm:$0xff pattern:$0x75316420] }
 0x259   : > { %v426_v29 = vsel %vm306_vm0, %v422_v12, 0.0  ;;  %v433_v32 = vsel %vm306_vm0, %v423_v22, 0.0  ;;  %449 = vst [vmem:[#allocation1] ss:$2 sm:$0xff] %v2413_v10 }
 0x25a   : > { %v427_v35 = vrot.slane %v426_v29, 4  ;;  %v434_v36 = vrot.slane %v433_v32, 4 }
 0x25c   : > { %v428_v0 = vadd.f32 %v427_v35, %v426_v29  ;;  %v435_v37 = vadd.f32 %v434_v36, %v433_v32  ;;  %v446_v32 = vsel %vm445_vm11, %v1865_v20, %v444_v1  ;;  %v2434_v20 = vpop.permute.xlu2 %898  ;;  %v2508_v1 = vpop.permute.xlu0 %545 }
 0x25e   : > { %v429_v41 = vrot.slane %v428_v0, 2  ;;  %v436_v43 = vrot.slane %v435_v37, 2 }
 0x260   : > { %v430_v44 = vadd.f32 %v429_v41, %v428_v0  ;;  %v437_v45 = vadd.f32 %v436_v43, %v435_v37  ;;  %v450_v46 = vld.sshfl [vmem:[#allocation1] sm:$0xff pattern:$0x75316420]  ;;  %v451_v47 = vld.sshfl [vmem:[#allocation1 + $0x8] sm:$0xff pattern:$0x75316420] }
 0x261   : > { %v454_v49 = vsel %vm306_vm0, %v450_v46, -inf  ;;  %v461_v50 = vsel %vm306_vm0, %v451_v47, -inf }
 0x262   : > { %v455_v51 = vrot.slane %v454_v49, 4  ;;  %v462_v54 = vrot.slane %v461_v50, 4  ;;  %v431_v56 = vrot.slane %v430_v44, 1  ;;  %v438_v59 = vrot.slane %v437_v45, 1 }
 0x264   : > { %v456_v61 = vmax.f32 %v454_v49, %v455_v51  ;;  %v463_v62 = vmax.f32 %v461_v50, %v462_v54  ;;  %v432_v12 = vadd.f32 %v431_v56, %v430_v44  ;;  %v439_v22 = vadd.f32 %v438_v59, %v437_v45  ;;  %v2439_v44 = vpop.permute.xlu2 %917 }
 0x266   : > { %v457_v4 = vrot.slane %v456_v61, 2  ;;  %v464_v7 = vrot.slane %v463_v62, 2  ;;  %v447_v0 = vmul.f32 %v446_v32, %v432_v12  ;;  %v448_v37 = vmul.f32 %v446_v32, %v439_v22  ;;  %v2513_v22 = vld [vmem:[#allocation5] sm:$0x7f] }
 0x268   : > { %v458_v25 = vmax.f32 %v456_v61, %v457_v4  ;;  %v465_v29 = vmax.f32 %v463_v62, %v464_v7  ;;  %v2500_v61 = vld [vmem:[#allocation7] sm:$0x7f]  ;;  %v2502_v62 = vld [vmem:[#allocation7 + $0x8] sm:$0x7f]  ;;  %v480_v4 = vlaneseq }
 0x269   : > { %v509_v7 = vrot.slane %v2500_v61, 1  ;;  %v510_v12 = vrot.slane %v2502_v62, 1 }
 0x26a   : > { %v459_v35 = vrot.slane %v458_v25, 1  ;;  %v466_v36 = vrot.slane %v465_v29, 1 }
 0x26b   : > { %v2520_v32 = vmul.f32 %v509_v7, %v2513_v22 }
 0x26c   : > { %v460_v40 = vmax.f32 %v458_v25, %v459_v35  ;;  %v467_v41 = vmax.f32 %v465_v29, %v466_v36  ;;  %v2444_v45 = vpop.permute.xlu2 %936  ;;  %v2515_v25 = vld [vmem:[#allocation5 + $0x8] sm:$0x7f]  ;;  %v2517_v29 = vand.u32 127, %v480_v4  ;;  %v2527_v36 = vmul.f32 %v2500_v61, %v2513_v22 }
 0x26d   : > { %v2523_v35 = vmul.f32 %v510_v12, %v2515_v25  ;;  %v515_v4 = vperm.slane %v2520_v32, 0 }
 0x26e   : > { %v2427_v43 = vsel %vm468_vm12, %v447_v0, %v460_v40  ;;  %v2429_v46 = vsel %vm468_vm12, %v448_v37, %v467_v41  ;;  %v2531_v0 = vmul.f32 %v2502_v62, %v2515_v25  ;;  %v534_v40 = vrot.slane %v2500_v61, 2 }
 0x26f   : > { %478 = vrot.lane.b32.xlu2 %v2429_v46, %s2087_s18  ;;  %500 = vrot.lane.b32.xlu0 %v2427_v43, %s2088_s29  ;;  %v535_v41 = vrot.slane %v2502_v62, 2  ;;  %vm504_vm13 = vcmp.lt.s32.totalorder %v2517_v29, 50  ;;  %v516_v7 = vperm.slane %v2523_v35, 0  ;;  %vm482_vm14 = vcmp.lt.s32.totalorder %v2517_v29, 51 }
 0x270   : > { %476 = vrot.lane.b32.xlu1 %v2427_v43, %s2087_s18  ;;  %s2100_s18 = smov 115   ;;  %v487_v12 = vperm.slane %v2527_v36, 0  ;;  %v488_v10 = vperm.slane %v2531_v0, 0  ;;  %vm531_vm15 = vcmp.lt.s32.totalorder %v2517_v29, 49  ;;  %vm556_vm1 = vcmp.lt.s32.totalorder %v2517_v29, 48 }
 0x271   : > { %v2551_v33 = vmul.f32 %v535_v41, %v2515_v25  ;;  %v585_v41 = vrot.slane %v2502_v62, 4  ;;  %vm581_vm2 = vcmp.lt.s32.totalorder %v2517_v29, 47  ;;  %vm606_vm3 = vcmp.lt.s32.totalorder %v2517_v29, 46 }
 0x272   : > { %vm631_vm5 = vcmp.lt.s32.totalorder %v2517_v29, 45  ;;  %vm656_vm6 = vcmp.lt.s32.totalorder %v2517_v29, 35  ;;  %vm681_vm7 = vcmp.lt.s32.totalorder %v2517_v29, 34  ;;  %vm700_vm8 = vcmp.lt.s32.totalorder %v2517_v29, 33 }
 0x273   : > { %vm719_vm9 = vcmp.lt.s32.totalorder %v2517_v29, 32  ;;  %vm738_vm10 = vcmp.lt.s32.totalorder %v2517_v29, 31  ;;  %vm757_vm11 = vcmp.lt.s32.totalorder %v2517_v29, 30  ;;  %vm776_vm12 = vcmp.lt.s32.totalorder %v2517_v29, 29 }
 0x274   : > { %v2449_v47 = vpop.permute.xlu2 %955 }
 0x277   : > { %502 = vrot.lane.b32.xlu2 %v2429_v46, %s2088_s29  ;;  %579 = vrot.lane.b32.xlu0 %v2429_v46, %s2089_s7  ;;  %s2101_s29 = smov 32  }
 0x278   : > { %529 = vrot.lane.b32.xlu1 %v2429_v46, %s2090_s9 }
 0x27c   : > { %v2459_v48 = vpop.permute.xlu2 %974 }
 0x27f   : > { %527 = vrot.lane.b32.xlu2 %v2427_v43, %s2090_s9  ;;  %604 = vrot.lane.b32.xlu0 %v2429_v46, %s2091_s10  ;;  %s2103_s9 = smov 31  }
 0x280   : > { %554 = vrot.lane.b32.xlu1 %v2429_v46, %s2092_s30 }
 0x284   : > { %v2465_v49 = vpop.permute.xlu2 %1290 }
 0x285   : > { %3070 = vst [vmem:[#allocation24_spill] sm:$0xff] %v2465_v49  ;;  %v2548_v49 = vmul.f32 %v534_v40, %v2513_v22 }
 0x287   : > { %552 = vrot.lane.b32.xlu2 %v2427_v43, %s2092_s30  ;;  %629 = vrot.lane.b32.xlu0 %v2429_v46, %s2093_s17  ;;  %s2105_s30 = smov 30  }
 0x288   : > { %577 = vrot.lane.b32.xlu1 %v2427_v43, %s2089_s7  ;;  %s2102_s7 = smov 114  }
 0x28c   : > { %v2471_v50 = vpop.permute.xlu2 %1309 }
 0x28d   : > { %3071 = vst [vmem:[#allocation25_spill] sm:$0xff] %v2471_v50 }
 0x28f   : > { %995 = vrot.lane.b32.xlu2 %v2429_v46, %s2094_s27  ;;  %654 = vrot.lane.b32.xlu0 %v2429_v46, %s2095_s8 }
 0x290   : > { %602 = vrot.lane.b32.xlu1 %v2427_v43, %s2091_s10  ;;  %s2104_s10 = smov 113  }
 0x294   : > { %v2477_v51 = vpop.permute.xlu2 %1328 }
 0x295   : > { %3072 = vst [vmem:[#allocation26_spill] sm:$0xff] %v2477_v51 }
 0x297   : > { %1014 = vrot.lane.b32.xlu2 %v2429_v46, %s2096_s12  ;;  %679 = vrot.lane.b32.xlu0 %v2429_v46, %s2097_s13 }
 0x298   : > { %627 = vrot.lane.b32.xlu1 %v2427_v43, %s2093_s17  ;;  %s2106_s17 = smov 112  }
 0x29c   : > { %v2486_v54 = vpop.permute.xlu2 %1347 }
 0x29d   : > { %3073 = vst [vmem:[#allocation27_spill] sm:$0xff] %v2486_v54 }
 0x29f   : > { %1033 = vrot.lane.b32.xlu2 %v2429_v46, %s2098_s14  ;;  %698 = vrot.lane.b32.xlu0 %v2429_v46, %s2099_s15 }
 0x2a0   : > { %652 = vrot.lane.b32.xlu1 %v2427_v43, %s2095_s8  ;;  %s2107_s8 = smov 29  }
 0x2a4   : > { %v2493_v56 = vpop.permute.xlu2 %1366 }
 0x2a5   : > { %3074 = vst [vmem:[#allocation28_spill] sm:$0xff] %v2493_v56 }
 0x2a7   : > { %1052 = vrot.lane.b32.xlu2 %v2429_v46, %s2100_s18  ;;  %717 = vrot.lane.b32.xlu0 %v2429_v46, %s2101_s29 }
 0x2a8   : > { %677 = vrot.lane.b32.xlu1 %v2427_v43, %s2097_s13  ;;  %s2108_s13 = smov 111  }
 0x2af   : > { %1071 = vrot.lane.b32.xlu2 %v2429_v46, %s2102_s7  ;;  %736 = vrot.lane.b32.xlu0 %v2429_v46, %s2103_s9 }
 0x2b0   : > { %696 = vrot.lane.b32.xlu1 %v2427_v43, %s2099_s15  ;;  %s2109_s15 = smov 19  }
 0x2b7   : > { %1090 = vrot.lane.b32.xlu2 %v2429_v46, %s2104_s10  ;;  %755 = vrot.lane.b32.xlu0 %v2429_v46, %s2105_s30 }
 0x2b8   : > { %715 = vrot.lane.b32.xlu1 %v2427_v43, %s2101_s29  ;;  %s2110_s29 = smov 110  }
 0x2bf   : > { %1109 = vrot.lane.b32.xlu2 %v2429_v46, %s2106_s17  ;;  %774 = vrot.lane.b32.xlu0 %v2429_v46, %s2107_s8 }
 0x2c0   : > { %734 = vrot.lane.b32.xlu1 %v2427_v43, %s2103_s9  ;;  %s2112_s9 = smov 109  }
 0x2c7   : > { %1128 = vrot.lane.b32.xlu2 %v2429_v46, %s2108_s13  ;;  %793 = vrot.lane.b32.xlu0 %v2429_v46, %s2109_s15 }
 0x2c8   : > { %753 = vrot.lane.b32.xlu1 %v2427_v43, %s2105_s30  ;;  %s2113_s30 = smov 17  }
 0x2c9   : > { %v479_v59 = vpop.permute.xlu2 %478 }
 0x2cf   : > { %1147 = vrot.lane.b32.xlu2 %v2429_v46, %s2110_s29  ;;  %812 = vrot.lane.b32.xlu0 %v2429_v46, %s2111_s11 }
 0x2d0   : > { %772 = vrot.lane.b32.xlu1 %v2427_v43, %s2107_s8  ;;  %s3047_s8 = smov 99  }
 0x2d1   : > { %v503_v37 = vpop.permute.xlu2 %502 }
 0x2d7   : > { %1166 = vrot.lane.b32.xlu2 %v2429_v46, %s2112_s9  ;;  %831 = vrot.lane.b32.xlu0 %v2429_v46, %s2113_s30 }
 0x2d8   : > { %791 = vrot.lane.b32.xlu1 %v2427_v43, %s2109_s15  ;;  %s2115_s15 = smov 16  }
 0x2df   : > { %1185 = vrot.lane.b32.xlu2 %v2429_v46, %s3047_s8  ;;  %850 = vrot.lane.b32.xlu0 %v2429_v46, %s2115_s15  ;;  %s2117_s8 = smov 15  }
 0x2e0   : > { %810 = vrot.lane.b32.xlu1 %v2427_v43, %s2111_s11  ;;  %s3048_s11 = smov 98  }
 0x2e1   : > { %v501_v56 = vpop.permute.xlu0 %500 }
 0x2e2   : > { %v477_v54 = vpop.permute.xlu1 %476  ;;  %v505_v51 = vsel %vm504_vm13, %v501_v56, %v503_v37  ;;  %v506_v50 = vsel %vm504_vm13, %v503_v37, %v501_v56  ;;  %vm795_vm13 = vcmp.lt.s32.totalorder %v2517_v29, 19 }
 0x2e3   : > { %v483_v30 = vsel %vm482_vm14, %v477_v54, %v479_v59  ;;  %v484_v27 = vsel %vm482_vm14, %v479_v59, %v477_v54  ;;  %v517_v24 = vmul.f32 %v515_v4, %v506_v50  ;;  %v518_v21 = vmul.f32 %v516_v7, %v505_v51 }
 0x2e4   : > { %v489_v18 = vmul.f32 %v487_v12, %v484_v27  ;;  %v490_v15 = vmul.f32 %v488_v10, %v483_v30  ;;  %v540_v27 = vperm.slane %v2548_v49, 0  ;;  %v528_v30 = vpop.permute.xlu2 %527  ;;  %vm814_vm14 = vcmp.lt.s32.totalorder %v2517_v29, 18 }
 0x2e5   : > { %v523_v11 = vmul.f32 %v2349_v3, %v517_v24  ;;  %v524_v8 = vmul.f32 %v2349_v3, %v518_v21  ;;  %v541_v24 = vperm.slane %v2551_v33, 0 }
 0x2e6   : > { %v496_v5 = vmul.f32 %v2344_v63, %v489_v18  ;;  %v497_v56 = vmul.f32 %v2344_v63, %v490_v15  ;;  %v559_v63 = vrot.slane %v2500_v61, 3  ;;  %v560_v15 = vrot.slane %v2502_v62, 3 }
 0x2e7   : > { %1204 = vrot.lane.b32.xlu2 %v2429_v46, %s3048_s11  ;;  %869 = vrot.lane.b32.xlu0 %v2429_v46, %s2117_s8  ;;  %s2119_s11 = smov 14  }
 0x2e8   : > { %v525_v3 = vadd.f32 %v523_v11, %v496_v5  ;;  %v526_v21 = vadd.f32 %v524_v8, %v497_v56  ;;  %829 = vrot.lane.b32.xlu1 %v2427_v43, %s2113_s30  ;;  %v2569_v37 = vmul.f32 %v559_v63, %v2513_v22  ;;  %v2572_v40 = vmul.f32 %v560_v15, %v2515_v25  ;;  %s3049_s30 = smov 97  }
 0x2e9   : > { %v580_v18 = vpop.permute.xlu0 %579  ;;  %v584_v11 = vrot.slane %v2500_v61, 4 }
 0x2ea   : > { %v530_v10 = vpop.permute.xlu1 %529  ;;  %v566_v12 = vperm.slane %v2572_v40, 0 }
 0x2eb   : > { %v532_v50 = vsel %vm531_vm15, %v528_v30, %v530_v10  ;;  %v533_v51 = vsel %vm531_vm15, %v530_v10, %v528_v30  ;;  %v2588_v15 = vmul.f32 %v584_v11, %v2513_v22  ;;  %v2591_v10 = vmul.f32 %v585_v41, %v2515_v25 }
 0x2ec   : > { %v542_v54 = vmul.f32 %v540_v27, %v533_v51  ;;  %v543_v59 = vmul.f32 %v541_v24, %v532_v50  ;;  %v553_v27 = vpop.permute.xlu2 %552  ;;  %v610_v11 = vrot.slane %v2502_v62, 5  ;;  %vm833_vm15 = vcmp.lt.s32.totalorder %v2517_v29, 17 }
 0x2ee   : > { %v548_v5 = vmul.f32 %v2508_v1, %v542_v54  ;;  %v549_v8 = vmul.f32 %v2508_v1, %v543_v59  ;;  %v565_v1 = vperm.slane %v2569_v37, 0  ;;  %v590_v54 = vperm.slane %v2588_v15, 0 }
 0x2ef   : > { %1223 = vrot.lane.b32.xlu2 %v2429_v46, %s3049_s30  ;;  %888 = vrot.lane.b32.xlu0 %v2429_v46, %s2119_s11  ;;  %s2121_s30 = smov 13   ;;  %v591_v59 = vperm.slane %v2591_v10, 0 }
 0x2f0   : > { %v550_v4 = vadd.f32 %v548_v5, %v525_v3  ;;  %v551_v7 = vadd.f32 %v549_v8, %v526_v21  ;;  %848 = vrot.lane.b32.xlu1 %v2427_v43, %s2115_s15  ;;  %s3050_s15 = smov 96  }
 0x2f1   : > { %v605_v56 = vpop.permute.xlu0 %604 }
 0x2f2   : > { %v555_v24 = vpop.permute.xlu1 %554 }
 0x2f3   : > { %v557_v30 = vsel %vm556_vm1, %v553_v27, %v555_v24  ;;  %v558_v63 = vsel %vm556_vm1, %v555_v24, %v553_v27  ;;  %vm852_vm1 = vcmp.lt.s32.totalorder %v2517_v29, 16 }
 0x2f4   : > { %v567_v3 = vmul.f32 %v565_v1, %v558_v63  ;;  %v568_v21 = vmul.f32 %v566_v12, %v557_v30 }
 0x2f6   : > { %v573_v50 = vmul.f32 %v2354_v6, %v567_v3  ;;  %v574_v51 = vmul.f32 %v2354_v6, %v568_v21  ;;  %v609_v6 = vrot.slane %v2500_v61, 5  ;;  %v2610_v3 = vmul.f32 %v610_v11, %v2515_v25 }
 0x2f7   : > { %1242 = vrot.lane.b32.xlu2 %v2429_v46, %s3050_s15  ;;  %907 = vrot.lane.b32.xlu0 %v2429_v46, %s2121_s30  ;;  %s2123_s15 = smov 3   ;;  %v635_v21 = vrot.slane %v2502_v62, 6 }
 0x2f8   : > { %v575_v5 = vadd.f32 %v573_v50, %v550_v4  ;;  %v576_v8 = vadd.f32 %v574_v51, %v551_v7  ;;  %867 = vrot.lane.b32.xlu1 %v2427_v43, %s2117_s8  ;;  %v2607_v63 = vmul.f32 %v609_v6, %v2513_v22  ;;  %s3051_s8 = smov 95  }
 0x2f9   : > { %v630_v41 = vpop.permute.xlu0 %629 }
 0x2fa   : > { %v578_v1 = vpop.permute.xlu1 %577 }
 0x2fb   : > { %v582_v12 = vsel %vm581_vm2, %v578_v1, %v580_v18  ;;  %v583_v27 = vsel %vm581_vm2, %v580_v18, %v578_v1  ;;  %v634_v18 = vrot.slane %v2500_v61, 6  ;;  %vm871_vm2 = vcmp.lt.s32.totalorder %v2517_v29, 15 }
 0x2fc   : > { %v592_v24 = vmul.f32 %v590_v54, %v583_v27  ;;  %v593_v30 = vmul.f32 %v591_v59, %v582_v12  ;;  %v616_v54 = vperm.slane %v2610_v3, 0  ;;  %v2629_v27 = vmul.f32 %v635_v21, %v2515_v25 }
 0x2fd   : > { %v2626_v12 = vmul.f32 %v634_v18, %v2513_v22  ;;  %v660_v21 = vrot.slane %v2502_v62, 7 }
 0x2fe   : > { %v598_v4 = vmul.f32 %v2359_v9, %v592_v24  ;;  %v599_v7 = vmul.f32 %v2359_v9, %v593_v30  ;;  %v615_v9 = vperm.slane %v2607_v63, 0 }
 0x2ff   : > { %1261 = vrot.lane.b32.xlu2 %v2429_v46, %s3051_s8  ;;  %926 = vrot.lane.b32.xlu0 %v2429_v46, %s2123_s15  ;;  %s2125_s8 = smov 2   ;;  %v2648_v2 = vmul.f32 %v660_v21, %v2515_v25 }
 0x300   : > { %v600_v50 = vadd.f32 %v598_v4, %v575_v5  ;;  %v601_v51 = vadd.f32 %v599_v7, %v576_v8  ;;  %886 = vrot.lane.b32.xlu1 %v2427_v43, %s2119_s11  ;;  %s2124_s11 = smov 94   ;;  %v641_v4 = vperm.slane %v2629_v27, 0 }
 0x301   : > { %v655_v59 = vpop.permute.xlu0 %654  ;;  %v666_v25 = vperm.slane %v2648_v2, 1 }
 0x302   : > { %v603_v6 = vpop.permute.xlu1 %602 }
 0x303   : > { %v607_v11 = vsel %vm606_vm3, %v603_v6, %v605_v56  ;;  %v608_v1 = vsel %vm606_vm3, %v605_v56, %v603_v6  ;;  %v640_v56 = vperm.slane %v2626_v12, 0  ;;  %vm890_vm3 = vcmp.lt.s32.totalorder %v2517_v29, 14 }
 0x304   : > { %v617_v24 = vmul.f32 %v615_v9, %v608_v1  ;;  %v618_v5 = vmul.f32 %v616_v54, %v607_v11 }
 0x306   : > { %v623_v8 = vmul.f32 %v2364_v13, %v617_v24  ;;  %v624_v30 = vmul.f32 %v2364_v13, %v618_v5  ;;  %v659_v13 = vrot.slane %v2500_v61, 7 }
 0x307   : > { %1280 = vrot.lane.b32.xlu2 %v2429_v46, %s2124_s11  ;;  %945 = vrot.lane.b32.xlu0 %v2429_v46, %s2125_s8 }
 0x308   : > { %v625_v7 = vadd.f32 %v623_v8, %v600_v50  ;;  %v626_v18 = vadd.f32 %v624_v30, %v601_v51  ;;  %905 = vrot.lane.b32.xlu1 %v2427_v43, %s2121_s30  ;;  %v2645_v5 = vmul.f32 %v659_v13, %v2513_v22  ;;  %s2126_s30 = smov 1  }
 0x309   : > { %v680_v9 = vpop.permute.xlu0 %679 }
 0x30a   : > { %v628_v54 = vpop.permute.xlu1 %627  ;;  %v665_v22 = vperm.slane %v2645_v5, 1 }
 0x30b   : > { %v632_v6 = vsel %vm631_vm5, %v628_v54, %v630_v41  ;;  %v633_v11 = vsel %vm631_vm5, %v630_v41, %v628_v54  ;;  %v684_v54 = vperm.slane %v2527_v36, 1  ;;  %vm909_vm5 = vcmp.lt.s32.totalorder %v2517_v29, 13 }
 0x30c   : > { %v642_v1 = vmul.f32 %v640_v56, %v633_v11  ;;  %v643_v24 = vmul.f32 %v641_v4, %v632_v6 }
 0x30e   : > { %v648_v50 = vmul.f32 %v2369_v16, %v642_v1  ;;  %v649_v51 = vmul.f32 %v2369_v16, %v643_v24 }
 0x30f   : > { %964 = vrot.lane.b32.xlu0 %v2429_v46, %s2126_s30 }
 0x310   : > { %v650_v61 = vadd.f32 %v648_v50, %v625_v7  ;;  %v651_v62 = vadd.f32 %v649_v51, %v626_v18  ;;  %924 = vrot.lane.b32.xlu1 %v2427_v43, %s2123_s15  ;;  %s3077_s15 = smov 97  }
 0x311   : > { %v699_v41 = vpop.permute.xlu0 %698 }
 0x312   : > { %v653_v8 = vpop.permute.xlu1 %652 }
 0x313   : > { %v657_v30 = vsel %vm656_vm6, %v653_v8, %v655_v59  ;;  %v658_v56 = vsel %vm656_vm6, %v655_v59, %v653_v8  ;;  %v685_v59 = vperm.slane %v2531_v0, 1  ;;  %vm928_vm6 = vcmp.lt.s32.totalorder %v2517_v29, 3 }
 0x314   : > { %v667_v16 = vmul.f32 %v665_v22, %v658_v56  ;;  %v668_v4 = vmul.f32 %v666_v25, %v657_v30  ;;  %v703_v25 = vperm.slane %v2520_v32, 1 }
 0x316   : > { %v673_v13 = vmul.f32 %v2374_v19, %v667_v16  ;;  %v674_v21 = vmul.f32 %v2374_v19, %v668_v4 }
 0x317   : > { %993 = vrot.lane.b32.xlu0 %v2427_v43, %s2094_s27  ;;  %s2127_s27 = smov 93  }
 0x318   : > { %v675_v7 = vadd.f32 %v673_v13, %v650_v61  ;;  %v676_v18 = vadd.f32 %v674_v21, %v651_v62  ;;  %943 = vrot.lane.b32.xlu1 %v2427_v43, %s2125_s8  ;;  %s3078_s8 = smov 96  }
 0x319   : > { %v718_v6 = vpop.permute.xlu0 %717 }
 0x31a   : > { %v678_v11 = vpop.permute.xlu1 %677 }
 0x31b   : > { %v682_v1 = vsel %vm681_vm7, %v678_v11, %v680_v9  ;;  %v683_v24 = vsel %vm681_vm7, %v680_v9, %v678_v11  ;;  %v704_v9 = vperm.slane %v2523_v35, 1  ;;  %vm947_vm7 = vcmp.lt.s32.totalorder %v2517_v29, 2 }
 0x31c   : > { %v686_v50 = vmul.f32 %v684_v54, %v683_v24  ;;  %v687_v19 = vmul.f32 %v685_v59, %v682_v1  ;;  %v722_v54 = vperm.slane %v2548_v49, 1 }
 0x31e   : > { %v692_v51 = vmul.f32 %v2379_v23, %v686_v50  ;;  %v693_v22 = vmul.f32 %v2379_v23, %v687_v19 }
 0x31f   : > { %1012 = vrot.lane.b32.xlu0 %v2427_v43, %s2096_s12  ;;  %s2128_s12 = smov 83  }
 0x320   : > { %v694_v61 = vadd.f32 %v692_v51, %v675_v7  ;;  %v695_v62 = vadd.f32 %v693_v22, %v676_v18  ;;  %962 = vrot.lane.b32.xlu1 %v2427_v43, %s2126_s30  ;;  %s3079_s30 = smov 95  }
 0x321   : > { %v737_v8 = vpop.permute.xlu0 %736 }
 0x322   : > { %v697_v30 = vpop.permute.xlu1 %696 }
 0x323   : > { %v701_v56 = vsel %vm700_vm8, %v697_v30, %v699_v41  ;;  %v702_v16 = vsel %vm700_vm8, %v699_v41, %v697_v30  ;;  %v723_v41 = vperm.slane %v2551_v33, 1  ;;  %vm997_vm8 = vcmp.lt.s32.totalorder %v2517_v29, 127 }
 0x324   : > { %v705_v4 = vmul.f32 %v703_v25, %v702_v16  ;;  %v706_v23 = vmul.f32 %v704_v9, %v701_v56 }
 0x326   : > { %v711_v13 = vmul.f32 %v2385_v26, %v705_v4  ;;  %v712_v21 = vmul.f32 %v2385_v26, %v706_v23 }
 0x327   : > { %1031 = vrot.lane.b32.xlu0 %v2427_v43, %s2098_s14  ;;  %s2129_s14 = smov 82  }
 0x328   : > { %v713_v7 = vadd.f32 %v711_v13, %v694_v61  ;;  %v714_v18 = vadd.f32 %v712_v21, %v695_v62  ;;  %1297 = vrot.lane.b32.xlu1 %v2427_v43, %s2127_s27  ;;  %v741_v62 = vperm.slane %v2569_v37, 1 }
 0x329   : > { %v756_v59 = vpop.permute.xlu0 %755 }
 0x32a   : > { %v716_v11 = vpop.permute.xlu1 %715 }
 0x32b   : > { %v720_v1 = vsel %vm719_vm9, %v716_v11, %v718_v6  ;;  %v721_v24 = vsel %vm719_vm9, %v718_v6, %v716_v11  ;;  %v742_v6 = vperm.slane %v2572_v40, 1  ;;  %vm966_vm9 = vcmp.lt.s32.totalorder %v2517_v29, 1 }
 0x32c   : > { %v724_v26 = vmul.f32 %v722_v54, %v721_v24  ;;  %v725_v50 = vmul.f32 %v723_v41, %v720_v1 }
 0x32e   : > { %v730_v19 = vmul.f32 %v2389_v28, %v724_v26  ;;  %v731_v51 = vmul.f32 %v2389_v28, %v725_v50 }
 0x32f   : > { %1050 = vrot.lane.b32.xlu0 %v2427_v43, %s2100_s18  ;;  %s2130_s18 = smov 81  }
 0x330   : > { %v732_v22 = vadd.f32 %v730_v19, %v713_v7  ;;  %v733_v61 = vadd.f32 %v731_v51, %v714_v18  ;;  %1316 = vrot.lane.b32.xlu1 %v2427_v43, %s2128_s12  ;;  %v760_v7 = vperm.slane %v2588_v15, 1  ;;  %v779_v51 = vperm.slane %v2607_v63, 1 }
 0x331   : > { %v775_v25 = vpop.permute.xlu0 %774 }
 0x332   : > { %v735_v9 = vpop.permute.xlu1 %734 }
 0x333   : > { %v739_v30 = vsel %vm738_vm10, %v735_v9, %v737_v8  ;;  %v740_v56 = vsel %vm738_vm10, %v737_v8, %v735_v9  ;;  %v761_v8 = vperm.slane %v2591_v10, 1  ;;  %vm1016_vm10 = vcmp.lt.s32.totalorder %v2517_v29, 126 }
 0x334   : > { %v743_v28 = vmul.f32 %v741_v62, %v740_v56  ;;  %v744_v16 = vmul.f32 %v742_v6, %v739_v30 }
 0x336   : > { %v749_v4 = vmul.f32 %v2394_v31, %v743_v28  ;;  %v750_v23 = vmul.f32 %v2394_v31, %v744_v16 }
 0x337   : > { %1069 = vrot.lane.b32.xlu0 %v2427_v43, %s2102_s7  ;;  %s2131_s7 = smov 80  }
 0x338   : > { %v751_v13 = vadd.f32 %v749_v4, %v732_v22  ;;  %v752_v21 = vadd.f32 %v750_v23, %v733_v61  ;;  %1335 = vrot.lane.b32.xlu1 %v2427_v43, %s2129_s14  ;;  %v798_v4 = vperm.slane %v2626_v12, 2 }
 0x339   : > { %v794_v18 = vpop.permute.xlu0 %793 }
 0x33a   : > { %v754_v54 = vpop.permute.xlu1 %753 }
 0x33b   : > { %v758_v41 = vsel %vm757_vm11, %v754_v54, %v756_v59  ;;  %v759_v11 = vsel %vm757_vm11, %v756_v59, %v754_v54  ;;  %v780_v59 = vperm.slane %v2610_v3, 1  ;;  %vm1035_vm11 = vcmp.lt.s32.totalorder %v2517_v29, 125 }
 0x33c   : > { %v762_v31 = vmul.f32 %v760_v7, %v759_v11  ;;  %v763_v1 = vmul.f32 %v761_v8, %v758_v41 }
 0x33e   : > { %v768_v24 = vmul.f32 %v2399_v34, %v762_v31  ;;  %v769_v26 = vmul.f32 %v2399_v34, %v763_v1  ;;  %v817_v1 = vperm.slane %v2645_v5, 2 }
 0x33f   : > { %1088 = vrot.lane.b32.xlu0 %v2427_v43, %s2104_s10  ;;  %s2132_s10 = smov 79  }
 0x340   : > { %v770_v50 = vadd.f32 %v768_v24, %v751_v13  ;;  %v771_v19 = vadd.f32 %v769_v26, %v752_v21  ;;  %1354 = vrot.lane.b32.xlu1 %v2427_v43, %s2130_s18 }
 0x341   : > { %v813_v22 = vpop.permute.xlu0 %812 }
 0x342   : > { %v773_v61 = vpop.permute.xlu1 %772 }
 0x343   : > { %v777_v62 = vsel %vm776_vm12, %v773_v61, %v775_v25  ;;  %v778_v6 = vsel %vm776_vm12, %v775_v25, %v773_v61  ;;  %v799_v25 = vperm.slane %v2629_v27, 2  ;;  %vm1054_vm12 = vcmp.lt.s32.totalorder %v2517_v29, 115 }
 0x344   : > { %v781_v34 = vmul.f32 %v779_v51, %v778_v6  ;;  %v782_v9 = vmul.f32 %v780_v59, %v777_v62 }
 0x346   : > { %v787_v30 = vmul.f32 %v2402_v38, %v781_v34  ;;  %v788_v56 = vmul.f32 %v2402_v38, %v782_v9  ;;  %v836_v34 = vperm.slane %v2527_v36, 2 }
 0x347   : > { %1107 = vrot.lane.b32.xlu0 %v2427_v43, %s2106_s17  ;;  %s2133_s17 = smov 78  }
 0x348   : > { %v789_v28 = vadd.f32 %v787_v30, %v770_v50  ;;  %v790_v16 = vadd.f32 %v788_v56, %v771_v19  ;;  %1373 = vrot.lane.b32.xlu1 %v2427_v43, %s2131_s7 }
 0x349   : > { %v832_v23 = vpop.permute.xlu0 %831 }
 0x34a   : > { %v792_v13 = vpop.permute.xlu1 %791 }
 0x34b   : > { %v796_v21 = vsel %vm795_vm13, %v792_v13, %v794_v18  ;;  %v797_v7 = vsel %vm795_vm13, %v794_v18, %v792_v13  ;;  %v818_v18 = vperm.slane %v2648_v2, 2  ;;  %vm1073_vm13 = vcmp.lt.s32.totalorder %v2517_v29, 114 }
 0x34c   : > { %v800_v38 = vmul.f32 %v798_v4, %v797_v7  ;;  %v801_v8 = vmul.f32 %v799_v25, %v796_v21  ;;  %v855_v7 = vperm.slane %v2520_v32, 2 }
 0x34e   : > { %v806_v54 = vmul.f32 %v2405_v42, %v800_v38  ;;  %v807_v41 = vmul.f32 %v2405_v42, %v801_v8 }
 0x34f   : > { %1126 = vrot.lane.b32.xlu0 %v2427_v43, %s2108_s13  ;;  %s2134_s13 = smov 77  }
 0x350   : > { %v808_v11 = vadd.f32 %v806_v54, %v789_v28  ;;  %v809_v31 = vadd.f32 %v807_v41, %v790_v16  ;;  %1392 = vrot.lane.b32.xlu1 %v2427_v43, %s2132_s10 }
 0x351   : > { %v851_v24 = vpop.permute.xlu0 %850 }
 0x352   : > { %v811_v26 = vpop.permute.xlu1 %810 }
 0x353   : > { %v815_v50 = vsel %vm814_vm14, %v811_v26, %v813_v22  ;;  %v816_v19 = vsel %vm814_vm14, %v813_v22, %v811_v26  ;;  %v837_v22 = vperm.slane %v2531_v0, 2  ;;  %vm1092_vm14 = vcmp.lt.s32.totalorder %v2517_v29, 113 }
 0x354   : > { %v819_v42 = vmul.f32 %v817_v1, %v816_v19  ;;  %v820_v51 = vmul.f32 %v818_v18, %v815_v50  ;;  %v874_v50 = vperm.slane %v2548_v49, 2  ;;  %v875_v19 = vperm.slane %v2551_v33, 2 }
 0x356   : > { %v825_v59 = vmul.f32 %v2409_v58, %v819_v42  ;;  %v826_v61 = vmul.f32 %v2409_v58, %v820_v51 }
 0x357   : > { %1145 = vrot.lane.b32.xlu0 %v2427_v43, %s2110_s29  ;;  %s3075_s29 = smov 99  }
 0x358   : > { %v827_v62 = vadd.f32 %v825_v59, %v808_v11  ;;  %v828_v6 = vadd.f32 %v826_v61, %v809_v31  ;;  %1411 = vrot.lane.b32.xlu1 %v2427_v43, %s2133_s17 }
 0x359   : > { %v870_v9 = vpop.permute.xlu0 %869 }
 0x35a   : > { %v830_v30 = vpop.permute.xlu1 %829 }
 0x35b   : > { %v834_v56 = vsel %vm833_vm15, %v830_v30, %v832_v23  ;;  %v835_v28 = vsel %vm833_vm15, %v832_v23, %v830_v30  ;;  %v856_v23 = vperm.slane %v2523_v35, 2  ;;  %v893_v30 = vperm.slane %v2569_v37, 2 }
 0x35c   : > { %v838_v58 = vmul.f32 %v836_v34, %v835_v28  ;;  %v839_v16 = vmul.f32 %v837_v22, %v834_v56  ;;  %v894_v56 = vperm.slane %v2572_v40, 2  ;;  %v2763_v28 = vpop.permute.xlu2 %995  ;;  %vm1111_vm15 = vcmp.lt.s32.totalorder %v2517_v29, 112 }
 0x35e   : > { %v844_v4 = vmul.f32 %v2416_v17, %v838_v58  ;;  %v845_v25 = vmul.f32 %v2416_v17, %v839_v16 }
 0x35f   : > { %1164 = vrot.lane.b32.xlu0 %v2427_v43, %s2112_s9  ;;  %s3076_s9 = smov 98  }
 0x360   : > { %v846_v13 = vadd.f32 %v844_v4, %v827_v62  ;;  %v847_v21 = vadd.f32 %v845_v25, %v828_v6  ;;  %1430 = vrot.lane.b32.xlu1 %v2427_v43, %s2134_s13 }
 0x361   : > { %v889_v38 = vpop.permute.xlu0 %888 }
 0x362   : > { %v849_v8 = vpop.permute.xlu1 %848 }
 0x363   : > { %v853_v54 = vsel %vm852_vm1, %v849_v8, %v851_v24  ;;  %v854_v41 = vsel %vm852_vm1, %v851_v24, %v849_v8  ;;  %v912_v8 = vperm.slane %v2588_v15, 2  ;;  %vm1130_vm1 = vcmp.lt.s32.totalorder %v2517_v29, 111 }
 0x364   : > { %v857_v17 = vmul.f32 %v855_v7, %v854_v41  ;;  %v858_v11 = vmul.f32 %v856_v23, %v853_v54  ;;  %v913_v54 = vperm.slane %v2591_v10, 2 }
 0x366   : > { %v863_v31 = vmul.f32 %v2421_v39, %v857_v17  ;;  %v864_v1 = vmul.f32 %v2421_v39, %v858_v11 }
 0x367   : > { %1183 = vrot.lane.b32.xlu0 %v2427_v43, %s3075_s29  ;;  %s1509_s29 = scalar_lea.sflag [#allocation4], %s2270_s26 }
 0x368   : > { %v865_v18 = vadd.f32 %v863_v31, %v846_v13  ;;  %v866_v26 = vadd.f32 %v864_v1, %v847_v21 }
 0x369   : > { %v908_v42 = vpop.permute.xlu0 %907 }
 0x36a   : > { %v868_v51 = vpop.permute.xlu1 %867 }
 0x36b   : > { %v872_v24 = vsel %vm871_vm2, %v868_v51, %v870_v9  ;;  %v873_v59 = vsel %vm871_vm2, %v870_v9, %v868_v51  ;;  %v931_v51 = vperm.slane %v2607_v63, 3  ;;  %vm1149_vm2 = vcmp.lt.s32.totalorder %v2517_v29, 110 }
 0x36c   : > { %v876_v61 = vmul.f32 %v874_v50, %v873_v59  ;;  %v877_v62 = vmul.f32 %v875_v19, %v872_v24  ;;  %v932_v24 = vperm.slane %v2610_v3, 3 }
 0x36e   : > { %v882_v6 = vmul.f32 %v2425_v14, %v876_v61  ;;  %v883_v39 = vmul.f32 %v2425_v14, %v877_v62 }
 0x36f   : > { %1202 = vrot.lane.b32.xlu0 %v2427_v43, %s3076_s9 }
 0x370   : > { %v884_v34 = vadd.f32 %v882_v6, %v865_v18  ;;  %v885_v22 = vadd.f32 %v883_v39, %v866_v26 }
 0x371   : > { %v927_v9 = vpop.permute.xlu0 %926 }
 0x372   : > { %v887_v58 = vpop.permute.xlu1 %886 }
 0x373   : > { %v891_v16 = vsel %vm890_vm3, %v887_v58, %v889_v38  ;;  %v892_v4 = vsel %vm890_vm3, %v889_v38, %v887_v58  ;;  %v2772_v38 = vpop.permute.xlu2 %1014  ;;  %v950_v58 = vperm.slane %v2626_v12, 3  ;;  %vm1168_vm3 = vcmp.lt.s32.totalorder %v2517_v29, 109 }
 0x374   : > { %v895_v25 = vmul.f32 %v893_v30, %v892_v4  ;;  %v896_v13 = vmul.f32 %v894_v56, %v891_v16  ;;  %v951_v16 = vperm.slane %v2629_v27, 3 }
 0x376   : > { %v901_v14 = vmul.f32 %v2434_v20, %v895_v25  ;;  %v902_v21 = vmul.f32 %v2434_v20, %v896_v13 }
 0x377   : > { %1221 = vrot.lane.b32.xlu0 %v2427_v43, %s3077_s15 }
 0x378   : > { %v903_v7 = vadd.f32 %v901_v14, %v884_v34  ;;  %v904_v23 = vadd.f32 %v902_v21, %v885_v22 }
 0x379   : > { %v946_v41 = vpop.permute.xlu0 %945 }
 0x37a   : > { %v906_v17 = vpop.permute.xlu1 %905 }
 0x37b   : > { %v910_v11 = vsel %vm909_vm5, %v906_v17, %v908_v42  ;;  %v911_v31 = vsel %vm909_vm5, %v908_v42, %v906_v17  ;;  %v2781_v34 = vpop.permute.xlu2 %1033  ;;  %vm1187_vm5 = vcmp.lt.s32.totalorder %v2517_v29, 99 }
 0x37c   : > { %v914_v1 = vmul.f32 %v912_v8, %v911_v31  ;;  %v915_v18 = vmul.f32 %v913_v54, %v910_v11  ;;  %v982_v8 = vperm.slane %v2531_v0, 3  ;;  %v969_v11 = vperm.slane %v2645_v5, 3 }
 0x37d   : > { %v970_v31 = vperm.slane %v2648_v2, 3 }
 0x37e   : > { %v920_v20 = vmul.f32 %v2439_v44, %v914_v1  ;;  %v921_v26 = vmul.f32 %v2439_v44, %v915_v18  ;;  %v1000_v1 = vperm.slane %v2520_v32, 3 }
 0x37f   : > { %1240 = vrot.lane.b32.xlu0 %v2427_v43, %s3078_s8 }
 0x380   : > { %v922_v50 = vadd.f32 %v920_v20, %v903_v7  ;;  %v923_v19 = vadd.f32 %v921_v26, %v904_v23  ;;  %v981_v7 = vperm.slane %v2527_v36, 3 }
 0x381   : > { %v965_v59 = vpop.permute.xlu0 %964 }
 0x382   : > { %v925_v61 = vpop.permute.xlu1 %924  ;;  %v983_v20 = vmul.f32 %v981_v7, %v2427_v43 }
 0x383   : > { %v929_v42 = vsel %vm928_vm6, %v925_v61, %v927_v9  ;;  %v930_v62 = vsel %vm928_vm6, %v927_v9, %v925_v61  ;;  %v2794_v54 = vpop.permute.xlu2 %1052  ;;  %vm1206_vm6 = vcmp.lt.s32.totalorder %v2517_v29, 98 }
 0x384   : > { %v933_v6 = vmul.f32 %v931_v51, %v930_v62  ;;  %v934_v39 = vmul.f32 %v932_v24, %v929_v42  ;;  %v984_v51 = vmul.f32 %v982_v8, %v2429_v46 }
 0x386   : > { %v939_v44 = vmul.f32 %v2444_v45, %v933_v6  ;;  %v940_v22 = vmul.f32 %v2444_v45, %v934_v39  ;;  %v1019_v6 = vperm.slane %v2548_v49, 3  ;;  %v1020_v39 = vperm.slane %v2551_v33, 3 }
 0x387   : > { %1259 = vrot.lane.b32.xlu0 %v2427_v43, %s3079_s30 }
 0x388   : > { %v941_v30 = vadd.f32 %v939_v44, %v922_v50  ;;  %v942_v56 = vadd.f32 %v940_v22, %v923_v19 }
 0x389   : > { %v994_v9 = vpop.permute.xlu0 %993 }
 0x38a   : > { %v944_v4 = vpop.permute.xlu1 %943  ;;  %v998_v26 = vsel %vm997_vm8, %v994_v9, %v2763_v28  ;;  %v999_v50 = vsel %vm997_vm8, %v2763_v28, %v994_v9  ;;  %v989_v28 = vmul.f32 %v2330_v52, %v983_v20  ;;  %v1039_v9 = vperm.slane %v2572_v40, 3 }
 0x38b   : > { %v948_v25 = vsel %vm947_vm7, %v944_v4, %v946_v41  ;;  %v949_v13 = vsel %vm947_vm7, %v946_v41, %v944_v4  ;;  %v1002_v44 = vmul.f32 %v1000_v1, %v998_v26  ;;  %vm1225_vm7 = vcmp.lt.s32.totalorder %v2517_v29, 97 }
 0x38c   : > { %v952_v14 = vmul.f32 %v950_v58, %v949_v13  ;;  %v953_v21 = vmul.f32 %v951_v16, %v948_v25  ;;  %v1038_v16 = vperm.slane %v2569_v37, 3  ;;  %vm1244_vm8 = vcmp.lt.s32.totalorder %v2517_v29, 96 }
 0x38e   : > { %v958_v45 = vmul.f32 %v2449_v47, %v952_v14  ;;  %v959_v23 = vmul.f32 %v2449_v47, %v953_v21  ;;  %v1001_v47 = vperm.slane %v2523_v35, 3  ;;  %v1072_v14 = vpop.permute.xlu2 %1071  ;;  %v1008_v21 = vmul.f32 %v2332_v53, %v1002_v44 }
 0x38f   : > { %1278 = vrot.lane.b32.xlu0 %v2427_v43, %s2124_s11  ;;  %s1985_s11 = scalar_lea.hbm %s3029_s6, 16 }
 0x390   : > { %v960_v41 = vadd.f32 %v958_v45, %v941_v30  ;;  %v961_v17 = vadd.f32 %v959_v23, %v942_v56  ;;  %v1003_v22 = vmul.f32 %v1001_v47, %v999_v50  ;;  %v1058_v50 = vperm.slane %v2591_v10, 4 }
 0x391   : > { %v1013_v18 = vpop.permute.xlu0 %1012 }
 0x392   : > { %v963_v19 = vpop.permute.xlu1 %962  ;;  %v1017_v43 = vsel %vm1016_vm10, %v1013_v18, %v2772_v38  ;;  %v1018_v30 = vsel %vm1016_vm10, %v2772_v38, %v1013_v18  ;;  %vm1282_vm10 = vcmp.lt.s32.totalorder %v2517_v29, 94 }
 0x393   : > { %v967_v24 = vsel %vm966_vm9, %v963_v19, %v965_v59  ;;  %v968_v61 = vsel %vm966_vm9, %v965_v59, %v963_v19  ;;  %v990_v59 = vmul.f32 %v2330_v52, %v984_v51  ;;  %v1021_v38 = vmul.f32 %v1019_v6, %v1017_v43 }
 0x394   : > { %v971_v42 = vmul.f32 %v969_v11, %v968_v61  ;;  %v972_v62 = vmul.f32 %v970_v31, %v967_v24  ;;  %v1022_v13 = vmul.f32 %v1020_v39, %v1018_v30  ;;  %v1076_v43 = vperm.slane %v2607_v63, 4 }
 0x395   : > { %v1077_v30 = vperm.slane %v2610_v3, 4  ;;  %vm1263_vm9 = vcmp.lt.s32.totalorder %v2517_v29, 95 }
 0x396   : > { %v977_v56 = vmul.f32 %v2459_v48, %v971_v42  ;;  %v978_v58 = vmul.f32 %v2459_v48, %v972_v62  ;;  %v1009_v48 = vmul.f32 %v2332_v53, %v1003_v22  ;;  %v1091_v42 = vpop.permute.xlu2 %1090 }
 0x397   : > { %1299 = vrot.lane.b32.xlu0 %v2429_v46, %s2127_s27 }
 0x398   : > { %v979_v4 = vadd.f32 %v977_v56, %v960_v41  ;;  %v980_v25 = vadd.f32 %v978_v58, %v961_v17  ;;  %v1027_v41 = vmul.f32 %v2335_v55, %v1021_v38  ;;  %v1028_v17 = vmul.f32 %v2335_v55, %v1022_v13 }
 0x399   : > { %v1032_v7 = vpop.permute.xlu0 %1031  ;;  %v1096_v38 = vperm.slane %v2629_v27, 4 }
 0x39a   : > { %v991_v52 = vadd.f32 %v989_v28, %v979_v4  ;;  %v992_v45 = vadd.f32 %v990_v59, %v980_v25  ;;  %v1036_v23 = vsel %vm1035_vm11, %v1032_v7, %v2781_v34  ;;  %v1037_v8 = vsel %vm1035_vm11, %v2781_v34, %v1032_v7 }
 0x39b   : > { %v1040_v11 = vmul.f32 %v1038_v16, %v1036_v23  ;;  %v1041_v31 = vmul.f32 %v1039_v9, %v1037_v8  ;;  %v1057_v34 = vperm.slane %v2588_v15, 4  ;;  %v3080_v9 = vld [vmem:[#allocation12_spill] sm:$0xff]  ;;  %v1095_v25 = vperm.slane %v2626_v12, 4 }
 0x39c   : > { %v1010_v1 = vadd.f32 %v1008_v21, %v991_v52  ;;  %v1011_v47 = vadd.f32 %v1009_v48, %v992_v45  ;;  %v2135_v48 = vmov 45   ;;  %v1874_v52 = vld [vmem:[%s3026_s3] sm:$0x3]  ;;  %vm1301_vm11 = vcmp.lt.s32.totalorder %v2517_v29, 93 }
 0x39d   : > { %v1046_v18 = vmul.f32 %v2338_v57, %v1040_v11  ;;  %v1047_v20 = vmul.f32 %v2338_v57, %v1041_v31  ;;  %1853 = vset.pattern.permute.xlu2 %v2135_v48  ;;  %v3081_v31 = vld [vmem:[#allocation13_spill] sm:$0xff] }
 0x39e   : > { %v1029_v53 = vadd.f32 %v1027_v41, %v1010_v1  ;;  %v1030_v26 = vadd.f32 %v1028_v17, %v1011_v47  ;;  %v1110_v16 = vpop.permute.xlu2 %1109  ;;  %1385 = vperm.xlu2 %1853, %v1874_v52   ;;  %v1114_v41 = vperm.slane %v2645_v5, 4 }
 0x39f   : > { %1318 = vrot.lane.b32.xlu0 %v2429_v46, %s2128_s12  ;;  %s1640_s12 = sshll.u32 %s2195_s25, 3  ;;  %s3098_s25 = sshll.u32 %s2270_s26, 3 }
 0x3a0   : > { %v1048_v19 = vadd.f32 %v1046_v18, %v1029_v53  ;;  %v1049_v51 = vadd.f32 %v1047_v20, %v1030_v26  ;;  %v1115_v53 = vperm.slane %v2648_v2, 4 }
 0x3a1   : > { %v1051_v24 = vpop.permute.xlu0 %1050 }
 0x3a2   : > { %v1055_v55 = vsel %vm1054_vm12, %v1051_v24, %v2794_v54  ;;  %v1056_v61 = vsel %vm1054_vm12, %v2794_v54, %v1051_v24  ;;  %vm1320_vm12 = vcmp.lt.s32.totalorder %v2517_v29, 83 }
 0x3a3   : > { %v1059_v57 = vmul.f32 %v1057_v34, %v1055_v55  ;;  %v1060_v62 = vmul.f32 %v1058_v50, %v1056_v61  ;;  %v2137_v34 = vmov 46   ;;  %v3082_v55 = vld [vmem:[#allocation14_spill] sm:$0xff] }
 0x3a5   : > { %v1065_v6 = vmul.f32 %v2341_v60, %v1059_v57  ;;  %v1066_v39 = vmul.f32 %v2341_v60, %v1060_v62  ;;  %v1133_v57 = vperm.slane %v2527_v36, 4 }
 0x3a6   : > { %v1129_v17 = vpop.permute.xlu2 %1128  ;;  %1854 = vset.pattern.permute.xlu2 %v2137_v34 }
 0x3a7   : > { %v1067_v44 = vadd.f32 %v1065_v6, %v1048_v19  ;;  %v1068_v22 = vadd.f32 %v1066_v39, %v1049_v51  ;;  %1337 = vrot.lane.b32.xlu0 %v2429_v46, %s2129_s14  ;;  %1404 = vperm.xlu2 %1854, %v1874_v52   ;;  %v1134_v39 = vperm.slane %v2531_v0, 4 }
 0x3a9   : > { %v1070_v28 = vpop.permute.xlu0 %1069 }
 0x3aa   : > { %v1074_v54 = vsel %vm1073_vm13, %v1070_v28, %v1072_v14  ;;  %v1075_v56 = vsel %vm1073_vm13, %v1072_v14, %v1070_v28  ;;  %v2136_v14 = vmov 48   ;;  %v2138_v28 = vmov 47  }
 0x3ab   : > { %v1078_v58 = vmul.f32 %v1076_v43, %v1074_v54  ;;  %v1079_v59 = vmul.f32 %v1077_v30, %v1075_v56  ;;  %1856 = vset.pattern.permute.xlu1 %v2136_v14  ;;  %1857 = vset.pattern.permute.xlu0 %v2136_v14  ;;  %vm1339_vm13 = vcmp.lt.s32.totalorder %v2517_v29, 82 }
 0x3ac   : > { %1442 = vperm.xlu1 %1856, %v1874_v52  }
 0x3ad   : > { %v1084_v4 = vmul.f32 %v3080_v9, %v1078_v58  ;;  %v1085_v60 = vmul.f32 %v3080_v9, %v1079_v59  ;;  %v3083_v58 = vld [vmem:[#allocation15_spill] sm:$0xff] }
 0x3af   : > { %v1086_v13 = vadd.f32 %v1084_v4, %v1067_v44  ;;  %v1087_v21 = vadd.f32 %v1085_v60, %v1068_v22  ;;  %1356 = vrot.lane.b32.xlu0 %v2429_v46, %s2130_s18  ;;  %v1148_v44 = vpop.permute.xlu2 %1147  ;;  %1855 = vset.pattern.permute.xlu2 %v2138_v28  ;;  %v1152_v60 = vperm.slane %v2520_v32, 4  ;;  %v1209_v28 = vperm.slane %v2588_v15, 5 }
 0x3b0   : > { %1423 = vperm.xlu2 %1855, %v1874_v52   ;;  %v3084_v52 = vld [vmem:[#allocation16_spill] sm:$0xff] }
 0x3b1   : > { %v1089_v7 = vpop.permute.xlu0 %1088 }
 0x3b2   : > { %v1093_v45 = vsel %vm1092_vm14, %v1089_v7, %v1091_v42  ;;  %v1094_v23 = vsel %vm1092_vm14, %v1091_v42, %v1089_v7  ;;  %vm1358_vm14 = vcmp.lt.s32.totalorder %v2517_v29, 81 }
 0x3b3   : > { %v1097_v8 = vmul.f32 %v1095_v25, %v1093_v45  ;;  %v1098_v11 = vmul.f32 %v1096_v38, %v1094_v23  ;;  %v1153_v25 = vperm.slane %v2523_v35, 4 }
 0x3b5   : > { %v1103_v1 = vmul.f32 %v3081_v31, %v1097_v8  ;;  %v1104_v47 = vmul.f32 %v3081_v31, %v1098_v11  ;;  %v1171_v31 = vperm.slane %v2548_v49, 4 }
 0x3b7   : > { %v1105_v18 = vadd.f32 %v1103_v1, %v1086_v13  ;;  %v1106_v20 = vadd.f32 %v1104_v47, %v1087_v21  ;;  %1375 = vrot.lane.b32.xlu0 %v2429_v46, %s2131_s7  ;;  %v1167_v48 = vpop.permute.xlu2 %1166  ;;  %v1172_v1 = vperm.slane %v2551_v33, 4  ;;  %s1520_s7 = scalar_lea.hbm %s3029_s6, %s1640_s12 }
 0x3b9   : > { %v1108_v26 = vpop.permute.xlu0 %1107 }
 0x3ba   : > { %v1112_v50 = vsel %vm1111_vm15, %v1108_v26, %v1110_v16  ;;  %v1113_v19 = vsel %vm1111_vm15, %v1110_v16, %v1108_v26  ;;  %v3085_v26 = vld [vmem:[#allocation17_spill] sm:$0xff]  ;;  %vm1377_vm15 = vcmp.lt.s32.totalorder %v2517_v29, 80 }
 0x3bb   : > { %v1116_v51 = vmul.f32 %v1114_v41, %v1112_v50  ;;  %v1117_v24 = vmul.f32 %v1115_v53, %v1113_v19 }
 0x3bd   : > { %v1122_v61 = vmul.f32 %v3082_v55, %v1116_v51  ;;  %v1123_v42 = vmul.f32 %v3082_v55, %v1117_v24  ;;  %v1191_v24 = vperm.slane %v2572_v40, 5 }
 0x3bf   : > { %v1124_v62 = vadd.f32 %v1122_v61, %v1105_v18  ;;  %v1125_v6 = vadd.f32 %v1123_v42, %v1106_v20  ;;  %1394 = vrot.lane.b32.xlu0 %v2429_v46, %s2132_s10  ;;  %v1186_v53 = vpop.permute.xlu2 %1185  ;;  %s298_s10 = scalar_lea.vmem [#allocation8], %s3098_s25 }
 0x3c1   : > { %v1127_v22 = vpop.permute.xlu0 %1126 }
 0x3c2   : > { %v1131_v43 = vsel %vm1130_vm1, %v1127_v22, %v1129_v17  ;;  %v1132_v30 = vsel %vm1130_vm1, %v1129_v17, %v1127_v22  ;;  %vm1396_vm1 = vcmp.lt.s32.totalorder %v2517_v29, 79 }
 0x3c3   : > { %v1135_v54 = vmul.f32 %v1133_v57, %v1131_v43  ;;  %v1136_v56 = vmul.f32 %v1134_v39, %v1132_v30 }
 0x3c5   : > { %v1141_v59 = vmul.f32 %v3083_v58, %v1135_v54  ;;  %v1142_v16 = vmul.f32 %v3083_v58, %v1136_v56  ;;  %v1210_v54 = vperm.slane %v2591_v10, 5 }
 0x3c7   : > { %v1143_v9 = vadd.f32 %v1141_v59, %v1124_v62  ;;  %v1144_v4 = vadd.f32 %v1142_v16, %v1125_v6  ;;  %1413 = vrot.lane.b32.xlu0 %v2429_v46, %s2133_s17  ;;  %v3086_v6 = vld [vmem:[#allocation18_spill] sm:$0xff]  ;;  %v1205_v22 = vpop.permute.xlu2 %1204  ;;  %s1522_s17 = sshll.u32 %s298_s10, 4  ;;  %s1523_s17 = int_to_ptr.vmem [resolvable:$true] %s1522_s17 }
 0x3c9   : > { %v1146_v38 = vpop.permute.xlu0 %1145 }
 0x3ca   : > { %v1150_v13 = vsel %vm1149_vm2, %v1146_v38, %v1148_v44  ;;  %v1151_v21 = vsel %vm1149_vm2, %v1148_v44, %v1146_v38  ;;  %vm1415_vm2 = vcmp.lt.s32.totalorder %v2517_v29, 78 }
 0x3cb   : > { %v1154_v14 = vmul.f32 %v1152_v60, %v1150_v13  ;;  %v1155_v7 = vmul.f32 %v1153_v25, %v1151_v21  ;;  %v1228_v21 = vperm.slane %v2607_v63, 5 }
 0x3cd   : > { %v1160_v45 = vmul.f32 %v3084_v52, %v1154_v14  ;;  %v1161_v23 = vmul.f32 %v3084_v52, %v1155_v7 }
 0x3cf   : > { %v1162_v8 = vadd.f32 %v1160_v45, %v1143_v9  ;;  %v1163_v11 = vadd.f32 %v1161_v23, %v1144_v4  ;;  %1432 = vrot.lane.b32.xlu0 %v2429_v46, %s2134_s13  ;;  %v1190_v46 = vperm.slane %v2569_v37, 5  ;;  %v3087_v4 = vld [vmem:[#allocation19_spill] sm:$0xff]  ;;  %v1224_v14 = vpop.permute.xlu2 %1223  ;;  %s1524_s13 = sshll.u32 %s1520_s7, 4  ;;  %s1525_s13 = int_to_ptr.hbm [resolvable:$true] %s1524_s13 }
 0x3d0   : > { %s1979_s9 = sshra.s32 %s1525_s13, 4  ;;  %s1980_s9 = int_to_ptr.hbm [resolvable:$true] %s1979_s9 }
 0x3d1   : > { %v1165_v47 = vpop.permute.xlu0 %1164  ;;  %s1981_s15 = scalar_lea.hbm %s1980_s9, 8  ;;  %p1986_p9 = scmp.lt.s32.totalorder %s1980_s9, %s3029_s6 }
 0x3d2   : > { %v1169_v41 = vsel %vm1168_vm3, %v1165_v47, %v1167_v48  ;;  %v1170_v17 = vsel %vm1168_vm3, %v1167_v48, %v1165_v47  ;;  %v1229_v48 = vperm.slane %v2610_v3, 5  ;;  %vm1434_vm3 = vcmp.lt.s32.totalorder %v2517_v29, 77  ;;  %p1982_p1 = scmp.ne.s32.totalorder %s1980_s9, %s1981_s15  ;;  %p1987_p2 = scmp.lt.s32.totalorder %s1985_s11, %s1981_s15 }
 0x3d3   : > { %v1173_v18 = vmul.f32 %v1171_v31, %v1169_v41  ;;  %v1174_v20 = vmul.f32 %v1172_v1, %v1170_v17 }
 0x3d4   : > { %p1983_p4 = pnand %p1982_p1, %p2240_p3  ;;  %p1988_p10 = por %p1987_p2, %p1986_p9 }
 0x3d5   : > { %v1179_v34 = vmul.f32 %v3085_v26, %v1173_v18  ;;  %v1180_v50 = vmul.f32 %v3085_v26, %v1174_v20  ;;  %v1298_v18 = vpop.permute.xlu1 %1297 }
 0x3d6   : > { %p1984_p8 = pneg %p1983_p4 }
 0x3d7   : > { %v1181_v19 = vadd.f32 %v1179_v34, %v1162_v8  ;;  %v1182_v51 = vadd.f32 %v1180_v50, %v1163_v11  ;;  %v3088_v11 = vld [vmem:[#allocation20_spill] sm:$0xff] }
 0x3d8   : > { %p1989_p11 = pnand %p1988_p10, %p1984_p8 }
 0x3d9   : > { %v1184_v55 = vpop.permute.xlu0 %1183 }
 0x3da   : > { %v1188_v61 = vsel %vm1187_vm5, %v1184_v55, %v1186_v53  ;;  %v1189_v42 = vsel %vm1187_vm5, %v1186_v53, %v1184_v55 }
 0x3db   : > { %v1192_v57 = vmul.f32 %v1190_v46, %v1188_v61  ;;  %v1193_v62 = vmul.f32 %v1191_v24, %v1189_v42  ;;  %v1247_v42 = vperm.slane %v2626_v12, 5 }
 0x3dd   : > { %v1198_v39 = vmul.f32 %v3086_v6, %v1192_v57  ;;  %v1199_v44 = vmul.f32 %v3086_v6, %v1193_v62  ;;  %v1317_v53 = vpop.permute.xlu1 %1316  ;;  %v1248_v6 = vperm.slane %v2629_v27, 5 }
 0x3df   : > { %v1200_v43 = vadd.f32 %v1198_v39, %v1181_v19  ;;  %v1201_v30 = vadd.f32 %v1199_v44, %v1182_v51  ;;  %v1243_v19 = vpop.permute.xlu2 %1242 }
 0x3e1   : > { %v1203_v56 = vpop.permute.xlu0 %1202 }
 0x3e2   : > { %v1207_v58 = vsel %vm1206_vm6, %v1203_v56, %v1205_v22  ;;  %v1208_v59 = vsel %vm1206_vm6, %v1205_v22, %v1203_v56  ;;  %v1266_v22 = vperm.slane %v2645_v5, 5 }
 0x3e3   : > { %v1211_v16 = vmul.f32 %v1209_v28, %v1207_v58  ;;  %v1212_v9 = vmul.f32 %v1210_v54, %v1208_v59  ;;  %v1285_v59 = vperm.slane %v2527_v36, 5 }
 0x3e5   : > { %v1217_v60 = vmul.f32 %v3087_v4, %v1211_v16  ;;  %v1218_v25 = vmul.f32 %v3087_v4, %v1212_v9  ;;  %v2899_v34 = vpop.permute.xlu1 %1335  ;;  %v1286_v16 = vperm.slane %v2531_v0, 5 }
 0x3e7   : > { %v1219_v38 = vadd.f32 %v1217_v60, %v1200_v43  ;;  %v1220_v13 = vadd.f32 %v1218_v25, %v1201_v30  ;;  %v1262_v24 = vpop.permute.xlu2 %1261  ;;  %v1267_v43 = vperm.slane %v2648_v2, 5 }
 0x3e9   : > { %v1222_v7 = vpop.permute.xlu0 %1221 }
 0x3ea   : > { %v1226_v52 = vsel %vm1225_vm7, %v1222_v7, %v1224_v14  ;;  %v1227_v45 = vsel %vm1225_vm7, %v1224_v14, %v1222_v7 }
 0x3eb   : > { %v1230_v23 = vmul.f32 %v1228_v21, %v1226_v52  ;;  %v1231_v8 = vmul.f32 %v1229_v48, %v1227_v45  ;;  %v1304_v21 = vperm.slane %v2520_v32, 5  ;;  %v1305_v48 = vperm.slane %v2523_v35, 5 }
 0x3ed   : > { %v1236_v31 = vmul.f32 %v3088_v11, %v1230_v23  ;;  %v1237_v1 = vmul.f32 %v3088_v11, %v1231_v8  ;;  %v2901_v46 = vpop.permute.xlu1 %1354 }
 0x3ef   : > { %v1238_v47 = vadd.f32 %v1236_v31, %v1219_v38  ;;  %v1239_v41 = vadd.f32 %v1237_v1, %v1220_v13  ;;  %v1281_v62 = vpop.permute.xlu2 %1280  ;;  %v3089_v38 = vld [vmem:[#allocation21_spill] sm:$0xff]  ;;  %v3090_v31 = vld [vmem:[#allocation22_spill] sm:$0xff] }
 0x3f1   : > { %v1241_v17 = vpop.permute.xlu0 %1240 }
 0x3f2   : > { %v1245_v39 = vsel %vm1244_vm8, %v1241_v17, %v1243_v19  ;;  %v1246_v44 = vsel %vm1244_vm8, %v1243_v19, %v1241_v17  ;;  %v1324_v19 = vperm.slane %v2551_v33, 6  ;;  %v1361_v33 = vperm.slane %v2588_v15, 6 }
 0x3f3   : > { %v1249_v30 = vmul.f32 %v1247_v42, %v1245_v39  ;;  %v1250_v58 = vmul.f32 %v1248_v6, %v1246_v44  ;;  %v3091_v42 = vld [vmem:[#allocation24_spill] sm:$0xff]  ;;  %v1381_v15 = vperm.slane %v2610_v3, 6  ;;  %v3093_v3 = vld [vmem:[#allocation26_spill] sm:$0xff] }
 0x3f5   : > { %v2903_v61 = vpop.permute.xlu1 %1373  ;;  %v1255_v13 = vmul.f32 %v3089_v38, %v1249_v30  ;;  %v1256_v7 = vmul.f32 %v3089_v38, %v1250_v58 }
 0x3f7   : > { %v1257_v32 = vadd.f32 %v1255_v13, %v1238_v47 }
 0x3f8   : > { %v2923_v23 = vpop.permute.xlu2 %1385 }
 0x3f9   : > { %v1260_v20 = vpop.permute.xlu0 %1259 }
 0x3fa   : > { %v1264_v28 = vsel %vm1263_vm9, %v1260_v20, %v1262_v24  ;;  %v1265_v54 = vsel %vm1263_vm9, %v1262_v24, %v1260_v20  ;;  %v1323_v20 = vperm.slane %v2548_v49, 6  ;;  %v1258_v24 = vadd.f32 %v1256_v7, %v1239_v41  ;;  %v3092_v41 = vld [vmem:[#allocation25_spill] sm:$0xff] }
 0x3fb   : > { %v1268_v9 = vmul.f32 %v1266_v22, %v1264_v28  ;;  %v1269_v4 = vmul.f32 %v1267_v43, %v1265_v54  ;;  %v1400_v7 = vperm.slane %v2629_v27, 6 }
 0x3fd   : > { %v2914_v56 = vpop.permute.xlu1 %1392  ;;  %v1274_v1 = vmul.f32 %v3090_v31, %v1268_v9  ;;  %v1275_v17 = vmul.f32 %v3090_v31, %v1269_v4 }
 0x3ff   : > { %v1276_v49 = vadd.f32 %v1274_v1, %v1257_v32  ;;  %v1277_v47 = vadd.f32 %v1275_v17, %v1258_v24 }
 0x401   : > { %v1279_v26 = vpop.permute.xlu0 %1278 }
 0x402   : > { %v1283_v60 = vsel %vm1282_vm10, %v1279_v26, %v1281_v62  ;;  %v1284_v25 = vsel %vm1282_vm10, %v1281_v62, %v1279_v26 }
 0x403   : > { %v1287_v8 = vmul.f32 %v1285_v59, %v1283_v60  ;;  %v1288_v11 = vmul.f32 %v1286_v16, %v1284_v25  ;;  %v1380_v16 = vperm.slane %v2607_v63, 6  ;;  %v1399_v63 = vperm.slane %v2626_v12, 6 }
 0x405   : > { %v1293_v62 = vmul.f32 %v3091_v42, %v1287_v8  ;;  %v1294_v6 = vmul.f32 %v3091_v42, %v1288_v11  ;;  %v1412_v22 = vpop.permute.xlu1 %1411 }
 0x407   : > { %v1296_v59 = vadd.f32 %v1294_v6, %v1277_v47 }
 0x409   : > { %v1300_v50 = vpop.permute.xlu0 %1299 }
 0x40a   : > { %v1302_v52 = vsel %vm1301_vm11, %v1298_v18, %v1300_v50  ;;  %v1303_v45 = vsel %vm1301_vm11, %v1300_v50, %v1298_v18  ;;  %v1342_v18 = vperm.slane %v2569_v37, 6  ;;  %v1343_v50 = vperm.slane %v2572_v40, 6 }
 0x40b   : > { %v1306_v26 = vmul.f32 %v1304_v21, %v1302_v52  ;;  %v1307_v35 = vmul.f32 %v1305_v48, %v1303_v45  ;;  %v3094_v52 = vld [vmem:[#allocation27_spill] sm:$0xff] }
 0x40d   : > { %v1312_v43 = vmul.f32 %v3092_v41, %v1306_v26  ;;  %v1313_v30 = vmul.f32 %v3092_v41, %v1307_v35 }
 0x40f   : > { %v1315_v25 = vadd.f32 %v1313_v30, %v1296_v59 }
 0x411   : > { %v1319_v51 = vpop.permute.xlu0 %1318 }
 0x412   : > { %v1321_v39 = vsel %vm1320_vm12, %v1317_v53, %v1319_v51  ;;  %v1322_v44 = vsel %vm1320_vm12, %v1319_v51, %v1317_v53  ;;  %v1362_v53 = vperm.slane %v2591_v10, 6  ;;  %v1295_v51 = vadd.f32 %v1293_v62, %v1276_v49 }
 0x413   : > { %v1325_v54 = vmul.f32 %v1323_v20, %v1321_v39  ;;  %v1326_v58 = vmul.f32 %v1324_v19, %v1322_v44  ;;  %v1418_v20 = vperm.slane %v2645_v5, 6  ;;  %v3095_v19 = vld [vmem:[#allocation28_spill] sm:$0xff]  ;;  %v1437_v49 = vperm.slane %v2527_v36, 6 }
 0x414   : > { %v1314_v60 = vadd.f32 %v1312_v43, %v1295_v51 }
 0x415   : > { %v1331_v38 = vmul.f32 %v3093_v3, %v1325_v54  ;;  %v1332_v13 = vmul.f32 %v3093_v3, %v1326_v58 }
 0x417   : > { %v1333_v32 = vadd.f32 %v1331_v38, %v1314_v60  ;;  %v1334_v27 = vadd.f32 %v1332_v13, %v1315_v25 }
 0x419   : > { %v1338_v55 = vpop.permute.xlu0 %1337 }
 0x41a   : > { %v1340_v37 = vsel %vm1339_vm13, %v2899_v34, %v1338_v55  ;;  %v1341_v40 = vsel %vm1339_vm13, %v1338_v55, %v2899_v34  ;;  %v1405_v55 = vpop.permute.xlu2 %1404 }
 0x41b   : > { %v1344_v9 = vmul.f32 %v1342_v18, %v1340_v37  ;;  %v1345_v4 = vmul.f32 %v1343_v50, %v1341_v40 }
 0x41d   : > { %v1350_v12 = vmul.f32 %v3094_v52, %v1344_v9  ;;  %v1351_v45 = vmul.f32 %v3094_v52, %v1345_v4 }
 0x41f   : > { %v1352_v62 = vadd.f32 %v1350_v12, %v1333_v32 }
 0x421   : > { %v2907_v57 = vpop.permute.xlu0 %1356 }
 0x422   : > { %v1359_v34 = vsel %vm1358_vm14, %v2901_v46, %v2907_v57  ;;  %v1360_v10 = vsel %vm1358_vm14, %v2907_v57, %v2901_v46 }
 0x423   : > { %v1363_v46 = vmul.f32 %v1361_v33, %v1359_v34  ;;  %v1364_v57 = vmul.f32 %v1362_v53, %v1360_v10 }
 0x425   : > { %v1369_v24 = vmul.f32 %v3095_v19, %v1363_v46  ;;  %v1370_v18 = vmul.f32 %v3095_v19, %v1364_v57 }
 0x427   : > { %v1371_v47 = vadd.f32 %v1369_v24, %v1352_v62 }
 0x429   : > { %v1376_v14 = vpop.permute.xlu0 %1375 }
 0x42a   : > { %v1378_v21 = vsel %vm1377_vm15, %v2903_v61, %v1376_v14  ;;  %v1379_v48 = vsel %vm1377_vm15, %v1376_v14, %v2903_v61  ;;  %v1419_v61 = vperm.slane %v2648_v2, 6  ;;  %v1431_v14 = vpop.permute.xlu1 %1430  ;;  %v1424_v2 = vpop.permute.xlu2 %1423 }
 0x42b   : > { %v1382_v31 = vmul.f32 %v1380_v16, %v1378_v21  ;;  %v1383_v1 = vmul.f32 %v1381_v15, %v1379_v48 }
 0x42d   : > { %v1388_v6 = vmul.f32 %v2923_v23, %v1382_v31  ;;  %v1389_v39 = vmul.f32 %v2923_v23, %v1383_v1 }
 0x42f   : > { %v1390_v30 = vadd.f32 %v1388_v6, %v1371_v47 }
 0x431   : > { %v1395_v28 = vpop.permute.xlu0 %1394 }
 0x432   : > { %v1397_v8 = vsel %vm1396_vm1, %v2914_v56, %v1395_v28  ;;  %v1398_v11 = vsel %vm1396_vm1, %v1395_v28, %v2914_v56  ;;  %v1353_v56 = vadd.f32 %v1351_v45, %v1334_v27  ;;  %v1443_v53 = vpop.permute.xlu1 %1442 }
 0x433   : > { %v1401_v50 = vmul.f32 %v1399_v63, %v1397_v8  ;;  %v1402_v42 = vmul.f32 %v1400_v7, %v1398_v11 }
 0x434   : > { %v1372_v33 = vadd.f32 %v1370_v18, %v1353_v56 }
 0x435   : > { %v1407_v41 = vmul.f32 %v1405_v55, %v1401_v50  ;;  %v1408_v43 = vmul.f32 %v1405_v55, %v1402_v42 }
 0x436   : > { %v1391_v37 = vadd.f32 %v1389_v39, %v1372_v33  ;;  %v3099_v33 = vld [vmem:[#allocation23_spill] sm:$0xff] }
 0x437   : > { %v1409_v51 = vadd.f32 %v1407_v41, %v1390_v30 }
 0x438   : > { %v1410_v59 = vadd.f32 %v1408_v43, %v1391_v37 }
 0x439   : > { %v1414_v17 = vpop.permute.xlu0 %1413 }
 0x43a   : > { %v1416_v26 = vsel %vm1415_vm2, %v1412_v22, %v1414_v17  ;;  %v1417_v35 = vsel %vm1415_vm2, %v1414_v17, %v1412_v22  ;;  %v1438_v22 = vperm.slane %v2531_v0, 6 }
 0x43b   : > { %v1420_v5 = vmul.f32 %v1418_v20, %v1416_v26  ;;  %v1421_v44 = vmul.f32 %v1419_v61, %v1417_v35 }
 0x43d   : > { %v1426_v40 = vmul.f32 %v1424_v2, %v1420_v5  ;;  %v1427_v28 = vmul.f32 %v1424_v2, %v1421_v44 }
 0x43f   : > { %v1428_v15 = vadd.f32 %v1426_v40, %v1409_v51  ;;  %v1429_v36 = vadd.f32 %v1427_v28, %v1410_v59 }
 0x441   : > { %v1433_v54 = vpop.permute.xlu0 %1432 }
 0x442   : > { %v1435_v58 = vsel %vm1434_vm3, %v1431_v14, %v1433_v54  ;;  %v1436_v23 = vsel %vm1434_vm3, %v1433_v54, %v1431_v14 }
 0x443   : > { %v1439_v16 = vmul.f32 %v1437_v49, %v1435_v58  ;;  %v1440_v29 = vmul.f32 %v1438_v22, %v1436_v23 }
 0x445   : > { %v1445_v9 = vmul.f32 %v1443_v53, %v1439_v16  ;;  %v1446_v0 = vmul.f32 %v1443_v53, %v1440_v29 }
 0x447   : > { %v1447_v4 = vadd.f32 %v1445_v9, %v1428_v15  ;;  %v1448_v34 = vadd.f32 %v1446_v0, %v1429_v36 }
 0x449   : > { %v1449_v10 = vsel %vm366_vm4, %v1447_v4, 0.0  ;;  %v1456_v55 = vsel %vm366_vm4, %v1448_v34, 0.0 }
 0x44a   : > { %v1450_v60 = vrot.slane %v1449_v10, 4  ;;  %v1457_v25 = vrot.slane %v1456_v55, 4 }
 0x44c   : > { %v1451_v63 = vadd.f32 %v1450_v60, %v1449_v10  ;;  %v1458_v3 = vadd.f32 %v1457_v25, %v1456_v55 }
 0x44e   : > { %v1452_v38 = vrot.slane %v1451_v63, 2  ;;  %v1459_v13 = vrot.slane %v1458_v3, 2 }
 0x450   : > { %v1453_v21 = vadd.f32 %v1452_v38, %v1451_v63  ;;  %v1460_v48 = vadd.f32 %v1459_v13, %v1458_v3 }
 0x452   : > { %v1454_v46 = vrot.slane %v1453_v21, 1  ;;  %v1461_v57 = vrot.slane %v1460_v48, 1 }
 0x454   : > { %v1455_v7 = vadd.f32 %v1454_v46, %v1453_v21  ;;  %v1462_v52 = vadd.f32 %v1461_v57, %v1460_v48 }
 0x456   : > { %v1632_v12 = vmul.f32 -1.442695, %v1455_v7  ;;  %v1633_v45 = vmul.f32 -1.442695, %v1462_v52 }
 0x458   : > { %1866 = vpow2.f32 %v1632_v12 }
 0x459   : > { %1868 = vpow2.f32 %v1633_v45 }
 0x45e   : > { %v1867_v8 = vpop.eup %1866 }
 0x45f   : > { %v1869_v11 = vpop.eup %1868  ;;  %v1469_v31 = vadd.f32 1.0, %v1867_v8 }
 0x460   : > { %v1470_v1 = vadd.f32 1.0, %v1869_v11 }
 0x461   : > { %1870 = vrcp.f32 %v1469_v31  ;;  %vm1476_vm6 = vweird.f32 %v1469_v31  ;;  %v1482_v50 = vand.u32 2147483648, %v1469_v31  ;;  %v1480_v62 = vand.u32 2147483647, %v1469_v31 }
 0x462   : > { %1872 = vrcp.f32 %v1470_v1  ;;  %v1497_v35 = vand.u32 2147483648, %v1470_v1  ;;  %v1495_v24 = vand.u32 2147483647, %v1470_v1  ;;  %vm1491_vm8 = vweird.f32 %v1470_v1 }
 0x463   : > { %v1483_v44 = vor.u32 1.1754944e-38, %v1482_v50  ;;  %vm1481_vm11 = vcmp.eq.f32.partialorder %v1480_v62, 8.507059e+37 }
 0x464   : > { %v1498_v6 = vor.u32 1.1754944e-38, %v1497_v35  ;;  %vm1496_vm10 = vcmp.eq.f32.partialorder %v1495_v24, 8.507059e+37 }
 0x467   : > { %v1871_v17 = vpop.eup %1870 }
 0x468   : > { %v1873_v20 = vpop.eup %1872  ;;  %v1472_v61 = vmul.f32 %v1871_v17, %v1469_v31  ;;  %vm1477_vm4 = vweird.f32 %v1871_v17 }
 0x469   : > { %v1487_v14 = vmul.f32 %v1873_v20, %v1470_v1  ;;  %vm1492_vm5 = vweird.f32 %v1873_v20  ;;  %vm2981_vm7 = vmor %vm1476_vm6, %vm1477_vm4 }
 0x46a   : > { %v1473_v32 = vsub.f32 1.0, %v1472_v61  ;;  %vm1493_vm9 = vmor %vm1491_vm8, %vm1492_vm5 }
 0x46b   : > { %v1488_v27 = vsub.f32 1.0, %v1487_v14 }
 0x46c   : > { %v1474_v26 = vmul.f32 %v1871_v17, %v1473_v32 }
 0x46d   : > { %v1489_v19 = vmul.f32 %v1873_v20, %v1488_v27 }
 0x46e   : > { %v1475_v18 = vadd.f32 %v1871_v17, %v1474_v26 }
 0x46f   : > { %v1490_v56 = vadd.f32 %v1873_v20, %v1489_v19 }
 0x470   : > { %v1479_v39 = vsel %vm2981_vm7, %v1871_v17, %v1475_v18 }
 0x471   : > { %v1494_v5 = vsel %vm1493_vm9, %v1873_v20, %v1490_v56  ;;  %v1484_v22 = vsel %vm1481_vm11, %v1483_v44, %v1479_v39 }
 0x472   : > { %v1499_v2 = vsel %vm1496_vm10, %v1498_v6, %v1494_v5 }
 0x473   : > { %v1503_v49 = vrot.slane %v1499_v2, 4 }
 0x475   : > { %v1504_v47 = vsel %vm306_vm0, %v1484_v22, %v1503_v49 }
 0x476   : > { %v1506_v41 = vmul.f32 %v1504_v47, %v3099_v33 }
 0x478   : > { %1507 = vst [vmem:[%s298_s10] sm:$0xff] %v1506_v41 }
 0x479   : > { %1992 = shalt.err (!%p1989_p11)
}
 0x47a   : > { %1651 = dma.vmem_to_hbm [thread:$0]  (%p2240_p3), %s1523_s17, 128, %s1525_s13, %s1509_s29  }
 0x47b PF: > { %s1536_s26 = sand.u32 1, %s2023_s21   ;;  %p3100_p12 = scmp.ge.s32.totalorder %s2035_s24, 2 }
 0x47c   : > { %s1537_s14 = scalar_lea.sflag [#allocation4], %s1536_s26 }
 0x47d   : > { %p1665_p13 = pnand %p3100_p12, %p2209_p6 }
 0x47f   : > { %p1666_p0 = pneg %p1665_p13 }
 0x481   : > { %2018 = dma.done.wait (%p1666_p0), %s1537_s14, 128  }
 0x482   : > { %2020 = vsyncadd (%p1666_p0), %s1537_s14, 4294967168  ;;  %p20_p5 = scmp.ge.s32.totalorder %s2230_s16, 4   ;;  %s3101_s21 = smov %s2027_s22 }
 0x483   : > { %s3102_s22 = smov %s2031_s23  ;;  %s3103_s23 = smov %s2246_s20 }
 0x484   : > { %s3104_s24 = smov %s2230_s16  ;;  %22 = sbr.rel (!%p20_p5) target bundleno = 6 (0x6), region = 97 }
 0x489   :  { %1543 = vsyncpa [#allocation3], 1 }
 0x48a   :  { %1545 = vsyncpa [#allocation3 + $0x1], 1 }
 0x48b   :  { %1546 = vsyncpa [#allocation6], 1 }
 0x48c   :  { %1547 = vsyncpa [#allocation4], 1 }
 0x48d   :  { %1549 = vsyncpa [#allocation4 + $0x1], 1 }

</bundles_post_ra>
